<compile_context>
chip_gen: v7x
topology: tpu7x:2x2x1
jax: 0.10.0
libtpu: 0.0.40
codegen_flags: <defaults>
</compile_context>

<pallas_src>
import functools

import numpy as np
import jax
import jax.numpy as jnp
from jax import lax
from jax.experimental import pallas as pl
from jax.experimental.pallas import tpu as pltpu


def _round_up(v, m):
    return (v + m - 1) // m * m


def _conv2d_nchw(x, w, *, stride, dilation, padding):
    # Same semantics as torch.nn.functional.conv2d(x, w, padding, dilation, stride)
    return lax.conv_general_dilated(
        x, w, window_strides=stride,
        padding=[(padding[0], padding[0]), (padding[1], padding[1])],
        rhs_dilation=dilation,
        dimension_numbers=("NCHW", "OIHW", "NCHW"))


# ----------------------------------------------------------------------------
# Pallas kernel: one grid step = Tb time steps of the recurrence.
#   rst  = spk @ D                     (lateral Gram reset, MXU)
#   mem  = (mem - rst) * beta + conv_t * (1 - beta)   (leaky + soft reset)
#   mthr = mem * invnorm - b
#   spk  = Heaviside(mthr > 0)
# mem/spk persist across grid steps in VMEM scratch; the two regularization
# accumulators (running sum, running max of per-step sums) persist in SMEM.
# ----------------------------------------------------------------------------
def _make_snn_kernel(t_blk):
    def _snn_kernel(beta_sm, conv_ref, d_ref, invnorm_ref, brow_ref,
                    spk_rec_ref, stats_ref, mem_sc, spk_sc, acc_sm):
        tb = pl.program_id(0)
        last = pl.num_programs(0) - 1

        @pl.when(tb == 0)
        def _():
            mem_sc[...] = jnp.zeros_like(mem_sc)
            spk_sc[...] = jnp.zeros_like(spk_sc)
            acc_sm[0] = jnp.float32(0.0)      # running sum(spk)  ('squared')
            acc_sm[1] = jnp.float32(0.0)      # running max_t sum(spk_t) ('max')
            stats_ref[...] = jnp.zeros_like(stats_ref)

        beta = beta_sm[0]
        one_minus_beta = beta_sm[1]
        d = d_ref[...]                                       # (Cp, Cp)
        mshape = mem_sc.shape                                # (Mp, Cp)
        # hoist broadcasts out of the inner loop (broadcast_in_dim is not CSE'd)
        invnorm_b = jnp.broadcast_to(invnorm_ref[...], mshape)
        brow_b = jnp.broadcast_to(brow_ref[...], mshape)

        mem = mem_sc[...]
        spk = spk_sc[...]
        ssum = acc_sm[0]
        smax = acc_sm[1]

        # fully-unrolled inner time loop (t_blk <= 8, static trip count)
        for tt in range(t_blk):
            conv_t = conv_ref[tt]                            # (Mp, Cp)
            # lateral reset: einsum('abc,bd->adc', spk, d) in (M, C) layout
            rst = jnp.dot(spk, d, preferred_element_type=jnp.float32)
            mem = (mem - rst) * beta + conv_t * one_minus_beta
            mthr = mem * invnorm_b - brow_b
            spk = jnp.where(mthr > 0.0, 1.0, 0.0).astype(jnp.float32)
            spk_rec_ref[tt] = spk.astype(spk_rec_ref.dtype)
            step_sum = jnp.sum(spk)                          # spk^2 == spk (0/1)
            ssum = ssum + step_sum
            smax = jnp.maximum(smax, step_sum)

        mem_sc[...] = mem
        spk_sc[...] = spk
        acc_sm[0] = ssum
        acc_sm[1] = smax

        @pl.when(tb == last)
        def _():
            lane = lax.broadcasted_iota(jnp.int32, (1, 128), 1)
            stats_ref[...] = jnp.where(lane == 0, ssum,
                                       jnp.where(lane == 1, smax, 0.0))
    return _snn_kernel


# ----------------------------------------------------------------------------
# Wrapper
# ----------------------------------------------------------------------------
@functools.partial(
    jax.jit,
    static_argnames=("kernel_size", "dilation", "stride", "output_shape", "eps"))
def spiking_conv2d_forward(x, w, beta, b, *, kernel_size, dilation, stride,
                           output_shape, eps=1e-8):
    B, Cin, H, W = x.shape
    Cout = w.shape[0]
    # padding = ceil((kernel_size - 1) * dilation / 2), as in the torch module
    padding = tuple(int(np.ceil((k - 1) * d / 2))
                    for k, d in zip(kernel_size, dilation))

    x = x.astype(jnp.float32)
    w = w.astype(jnp.float32)

    # Time-independent conv2d hoisted out of the kernel: one big, MXU-friendly op.
    conv_x = _conv2d_nchw(x, w, stride=stride, dilation=dilation,
                          padding=padding)                   # (B, Cout, T, Wfull)
    conv_x = conv_x[:, :, :, :output_shape]                  # width crop
    T = conv_x.shape[2]
    Wc = output_shape
    M = B * Wc

    # Lane/sublane padding: lane-dense stores + full-width MXU tiles.
    Cp = _round_up(Cout, 128)
    Mp = _round_up(M, 8)

    # (B, Cout, T, Wc) -> (T, M, Cout) -> zero-padded (T, Mp, Cp)
    conv_tmc = jnp.transpose(conv_x, (2, 0, 3, 1)).reshape(T, M, Cout)
    conv_tmc = jnp.pad(conv_tmc, ((0, 0), (0, Mp - M), (0, Cp - Cout)))

    w_flat = w.reshape(Cout, -1)
    d = w_flat @ w_flat.T                                    # lateral Gram (Cout, Cout)
    d = jnp.pad(d, ((0, Cp - Cout), (0, Cp - Cout)))         # padded rows/cols = 0
    norm = jnp.sum(w_flat * w_flat, axis=1)                  # (Cout,)
    invnorm = jnp.pad(1.0 / (norm + eps), (0, Cp - Cout),
                      constant_values=1.0).reshape(1, Cp)
    # padded channels get b = 1 (> 0) so they never spike
    brow = jnp.pad(b.astype(jnp.float32), (0, Cp - Cout),
                   constant_values=1.0).reshape(1, Cp)
    beta_f = jnp.asarray(beta, jnp.float32).reshape(())
    beta_sm = jnp.stack([beta_f, 1.0 - beta_f]).astype(jnp.float32)  # [beta, 1-beta]

    # Time blocking: largest divisor of T that is <= 8.
    t_blk = 1
    for cand in range(min(T, 8), 0, -1):
        if T % cand == 0:
            t_blk = cand
            break
    n_blk = T // t_blk

    spk_rec_pad, stats = pl.pallas_call(
        _make_snn_kernel(t_blk),
        out_shape=(
            jax.ShapeDtypeStruct((T, Mp, Cp), jnp.bfloat16),   # spikes are exact 0/1
            jax.ShapeDtypeStruct((1, 128), jnp.float32),       # [sum, max, 0...]
        ),
        grid_spec=pltpu.PrefetchScalarGridSpec(
            num_scalar_prefetch=0,
            grid=(n_blk,),
            in_specs=[
                pl.BlockSpec(memory_space=pltpu.MemorySpace.SMEM),       # beta scalars
                pl.BlockSpec((t_blk, Mp, Cp), lambda tb: (tb, 0, 0)),    # conv stream
                pl.BlockSpec((Cp, Cp), lambda tb: (0, 0)),               # lateral Gram
                pl.BlockSpec((1, Cp), lambda tb: (0, 0)),                # 1/(norm+eps)
                pl.BlockSpec((1, Cp), lambda tb: (0, 0)),                # b
            ],
            out_specs=[
                pl.BlockSpec((t_blk, Mp, Cp), lambda tb: (tb, 0, 0)),    # spk_rec
                pl.BlockSpec((1, 128), lambda tb: (0, 0)),               # stats (last)
            ],
            scratch_shapes=[
                pltpu.VMEM((Mp, Cp), jnp.float32),   # mem
                pltpu.VMEM((Mp, Cp), jnp.float32),   # spk
                pltpu.SMEM((2,), jnp.float32),       # [running sum, running max]
            ],
        ),
        compiler_params=pltpu.CompilerParams(
            dimension_semantics=("arbitrary",)),     # sequential recurrence over time
    )(beta_sm, conv_tmc, d, invnorm, brow)

    # Strip padding and restore the torch layout (B, Cout, T, Wc).
    # TODO(synk): downstream consumers could take (T, B, Wc, Cout) directly and
    # skip this extra HBM read+write transpose.
    spk_rec = spk_rec_pad[:, :M, :Cout].astype(x.dtype)
    spk_rec = jnp.transpose(spk_rec.reshape(T, B, Wc, Cout), (1, 3, 0, 2))

    denom = T * B * Cout * Wc
    loss = 0.5 * stats[0, 0] / denom                         # 'squared' (spk^2 == spk)
    spk_spread_loss = stats[0, 1] / (B * Cout * Wc)          # 'max'
    # flatten_output=False -> output is spk_rec itself
    # TODO(synk): self.spk_rec_hist (host-side numpy copy) is stateful bookkeeping,
    # not part of the numerical forward pass; omitted.
    return spk_rec, (loss, spk_spread_loss)


# ----------------------------------------------------------------------------
# Pure-JAX reference of the same forward semantics (for correctness check)
# ----------------------------------------------------------------------------
def reference_forward(x, w, beta, b, *, kernel_size, dilation, stride,
                      output_shape, eps=1e-8):
    B, Cin, H, W = x.shape
    Cout = w.shape[0]
    padding = tuple(int(np.ceil((k - 1) * d / 2))
                    for k, d in zip(kernel_size, dilation))
    conv_x = _conv2d_nchw(x, w, stride=stride, dilation=dilation,
                          padding=padding)[:, :, :, :output_shape]
    T = conv_x.shape[2]
    d = jnp.einsum('abcd,ebcd->ae', w, w)
    norm = jnp.sum(w ** 2, axis=(1, 2, 3))
    mem = jnp.zeros((B, Cout, output_shape), x.dtype)
    spk = jnp.zeros((B, Cout, output_shape), x.dtype)
    recs = []
    for t in range(T):
        rst = jnp.einsum('abc,bd->adc', spk, d)
        input_ = conv_x[:, :, t, :]
        mem = (mem - rst) * beta + input_ * (1.0 - beta)
        mthr = jnp.einsum('abc,b->abc', mem, 1.0 / (norm + eps)) - b[None, :, None]
        spk = (mthr > 0.0).astype(x.dtype)
        recs.append(spk)
    spk_rec = jnp.stack(recs, axis=2)                        # (B, Cout, T, Wc)
    loss = 0.5 * jnp.mean(spk_rec ** 2)
    spread = jnp.max(jnp.sum(spk_rec, axis=(0, 1, 3))) / (B * Cout * output_shape)
    return spk_rec, (loss, spread)


if __name__ == "__main__":
    key = jax.random.PRNGKey(0)
    B, Cin, H, W = 2, 4, 16, 16
    Cout = 8
    kernel_size = (3, 3)
    dilation = (1, 1)
    stride = (1, 1)
    output_shape = 16            # neuron-grid width per channel (width crop)
    w_init_mean, w_init_std = 0.0, 1.0

    kw_key, kx_key = jax.random.split(key)
    # w ~ Normal(mean, std * sqrt(1/(Cin*prod(kernel)))) as in reset_parameters()
    w = (w_init_mean
         + w_init_std * np.sqrt(1.0 / (Cin * kernel_size[0] * kernel_size[1]))
         * jax.random.normal(kw_key, (Cout, Cin, *kernel_size), dtype=jnp.float32))
    # beta: 'one_per_layer', constant init, clamped to [0, 1]
    beta = jnp.clip(jnp.asarray(0.9, dtype=jnp.float32), 0.0, 1.0)
    # b: constant init, clamped to >= 0
    b = jnp.maximum(jnp.full((Cout,), 0.1, dtype=jnp.float32), 0.0)
    x = jax.random.normal(kx_key, (B, Cin, H, W), dtype=jnp.float32)

    spk_rec, (loss, spread) = spiking_conv2d_forward(
        x, w, beta, b, kernel_size=kernel_size, dilation=dilation,
        stride=stride, output_shape=output_shape)
    jax.block_until_ready(spk_rec)

    ref_spk, (ref_loss, ref_spread) = reference_forward(
        x, w, beta, b, kernel_size=kernel_size, dilation=dilation,
        stride=stride, output_shape=output_shape)

    assert spk_rec.shape == (B, Cout, H, output_shape), spk_rec.shape
    np.testing.assert_allclose(np.asarray(spk_rec), np.asarray(ref_spk),
                               atol=1e-5)
    np.testing.assert_allclose(float(loss), float(ref_loss), atol=1e-5)
    np.testing.assert_allclose(float(spread), float(ref_spread), atol=1e-5)

    print("KERNEL_OK")
</pallas_src>

<mosaic_0001>
module attributes {stable_mosaic.version = 11 : i64} {
  func.func @_snn_kernel(%arg0: i32, %arg1: memref<2xf32, #tpu.memory_space<smem>>, %arg2: memref<8x32x128xf32, #tpu.memory_space<vmem>>, %arg3: memref<128x128xf32, #tpu.memory_space<vmem>>, %arg4: memref<1x128xf32, #tpu.memory_space<vmem>>, %arg5: memref<1x128xf32, #tpu.memory_space<vmem>>, %arg6: memref<8x32x128xbf16, #tpu.memory_space<vmem>>, %arg7: memref<1x128xf32, #tpu.memory_space<vmem>>, %arg8: memref<32x128xf32, #tpu.memory_space<vmem>>, %arg9: memref<32x128xf32, #tpu.memory_space<vmem>>, %arg10: memref<2xf32, #tpu.memory_space<smem>>) attributes {dimension_semantics = [#tpu.dimension_semantics<arbitrary>], iteration_bounds = array<i64: 2>, scalar_prefetch = 0 : i64, scratch_operands = 3 : i64, tpu.core_type = #tpu.core_type<tc>, window_params = [{transform_indices = @transform_0, window_bounds = array<i64: 2>}, {transform_indices = @transform_1, window_bounds = array<i64: 8, 32, 128>}, {pipeline_mode = #tpu.pipeline_mode<synchronous>, transform_indices = @transform_2, window_bounds = array<i64: 128, 128>}, {pipeline_mode = #tpu.pipeline_mode<synchronous>, transform_indices = @transform_3, window_bounds = array<i64: 1, 128>}, {pipeline_mode = #tpu.pipeline_mode<synchronous>, transform_indices = @transform_4, window_bounds = array<i64: 1, 128>}, {transform_indices = @transform_5, window_bounds = array<i64: 8, 32, 128>}, {pipeline_mode = #tpu.pipeline_mode<synchronous>, transform_indices = @transform_6, window_bounds = array<i64: 1, 128>}]} {
    %c0_i32 = arith.constant 0 : i32
    %0 = arith.cmpi eq, %arg0, %c0_i32 : i32
    %1 = arith.extui %0 : i1 to i32
    %c0_i32_0 = arith.constant 0 : i32
    %2 = arith.cmpi ne, %1, %c0_i32_0 : i32
    scf.if %2 {
      %cst_101 = arith.constant 0.000000e+00 : f32
      %231 = vector.broadcast %cst_101 : f32 to vector<32x128xf32>
      %c0_102 = arith.constant 0 : index
      %c0_103 = arith.constant 0 : index
      %232 = vector.load %arg8[%c0_102, %c0_103] : memref<32x128xf32, #tpu.memory_space<vmem>>, vector<32x128xf32>
      tpu.vector_store %arg8[%c0_102, %c0_103], %231 {strides = array<i32>} : memref<32x128xf32, #tpu.memory_space<vmem>>, vector<32x128xf32>,
      %cst_104 = arith.constant 0.000000e+00 : f32
      %233 = vector.broadcast %cst_104 : f32 to vector<32x128xf32>
      %c0_105 = arith.constant 0 : index
      %c0_106 = arith.constant 0 : index
      %234 = vector.load %arg9[%c0_105, %c0_106] : memref<32x128xf32, #tpu.memory_space<vmem>>, vector<32x128xf32>
      tpu.vector_store %arg9[%c0_105, %c0_106], %233 {strides = array<i32>} : memref<32x128xf32, #tpu.memory_space<vmem>>, vector<32x128xf32>,
      %cst_107 = arith.constant 0.000000e+00 : f32
      %c0_108 = arith.constant 0 : index
      %235 = memref.load %arg10[%c0_108] : memref<2xf32, #tpu.memory_space<smem>>
      memref.store %cst_107, %arg10[%c0_108] : memref<2xf32, #tpu.memory_space<smem>>
      %cst_109 = arith.constant 0.000000e+00 : f32
      %c1_110 = arith.constant 1 : index
      %236 = memref.load %arg10[%c1_110] : memref<2xf32, #tpu.memory_space<smem>>
      memref.store %cst_109, %arg10[%c1_110] : memref<2xf32, #tpu.memory_space<smem>>
      %cst_111 = arith.constant 0.000000e+00 : f32
      %237 = vector.broadcast %cst_111 : f32 to vector<1x128xf32>
      %c0_112 = arith.constant 0 : index
      %c0_113 = arith.constant 0 : index
      %238 = vector.load %arg7[%c0_112, %c0_113] : memref<1x128xf32, #tpu.memory_space<vmem>>, vector<1x128xf32>
      tpu.vector_store %arg7[%c0_112, %c0_113], %237 {strides = array<i32>} : memref<1x128xf32, #tpu.memory_space<vmem>>, vector<1x128xf32>,
    } else {
    }
    %c0 = arith.constant 0 : index
    %3 = memref.load %arg1[%c0] : memref<2xf32, #tpu.memory_space<smem>>
    %c1 = arith.constant 1 : index
    %4 = memref.load %arg1[%c1] : memref<2xf32, #tpu.memory_space<smem>>
    %c0_1 = arith.constant 0 : index
    %c0_2 = arith.constant 0 : index
    %5 = vector.load %arg3[%c0_1, %c0_2] : memref<128x128xf32, #tpu.memory_space<vmem>>, vector<128x128xf32>
    %c0_3 = arith.constant 0 : index
    %c0_4 = arith.constant 0 : index
    %6 = vector.load %arg4[%c0_3, %c0_4] : memref<1x128xf32, #tpu.memory_space<vmem>>, vector<1x128xf32>
    %7 = vector.shape_cast %6 : vector<1x128xf32> to vector<1x128xf32>
    %8 = vector.broadcast %7 : vector<1x128xf32> to vector<32x128xf32>
    %c0_5 = arith.constant 0 : index
    %c0_6 = arith.constant 0 : index
    %9 = vector.load %arg5[%c0_5, %c0_6] : memref<1x128xf32, #tpu.memory_space<vmem>>, vector<1x128xf32>
    %10 = vector.shape_cast %9 : vector<1x128xf32> to vector<1x128xf32>
    %11 = vector.broadcast %10 : vector<1x128xf32> to vector<32x128xf32>
    %c0_7 = arith.constant 0 : index
    %c0_8 = arith.constant 0 : index
    %12 = vector.load %arg8[%c0_7, %c0_8] : memref<32x128xf32, #tpu.memory_space<vmem>>, vector<32x128xf32>
    %c0_9 = arith.constant 0 : index
    %c0_10 = arith.constant 0 : index
    %13 = vector.load %arg9[%c0_9, %c0_10] : memref<32x128xf32, #tpu.memory_space<vmem>>, vector<32x128xf32>
    %c0_11 = arith.constant 0 : index
    %14 = memref.load %arg10[%c0_11] : memref<2xf32, #tpu.memory_space<smem>>
    %c1_12 = arith.constant 1 : index
    %15 = memref.load %arg10[%c1_12] : memref<2xf32, #tpu.memory_space<smem>>
    %c0_13 = arith.constant 0 : index
    %c0_14 = arith.constant 0 : index
    %c0_15 = arith.constant 0 : index
    %16 = vector.load %arg2[%c0_13, %c0_14, %c0_15] : memref<8x32x128xf32, #tpu.memory_space<vmem>>, vector<1x32x128xf32>
    %17 = vector.shape_cast %16 : vector<1x32x128xf32> to vector<32x128xf32>
    %cst = arith.constant dense<0.000000e+00> : vector<32x128xf32>
    %18 = tpu.matmul %13, %5, %cst {dimension_numbers = #tpu.dot_dimension_numbers<[1], [0], [0], [1], [0, 0, 1, 1], [], []>} : vector<32x128xf32>, vector<128x128xf32>, vector<32x128xf32> -> vector<32x128xf32>
    %19 = arith.subf %12, %18 : vector<32x128xf32>
    %20 = vector.broadcast %3 : f32 to vector<32x128xf32>
    %21 = arith.mulf %19, %20 : vector<32x128xf32>
    %22 = vector.broadcast %4 : f32 to vector<32x128xf32>
    %23 = arith.mulf %17, %22 : vector<32x128xf32>
    %24 = arith.addf %21, %23 : vector<32x128xf32>
    %25 = arith.mulf %24, %8 : vector<32x128xf32>
    %26 = arith.subf %25, %11 : vector<32x128xf32>
    %cst_16 = arith.constant 0.000000e+00 : f32
    %27 = vector.broadcast %cst_16 : f32 to vector<32x128xf32>
    %28 = arith.cmpf ogt, %26, %27 : vector<32x128xf32>
    %cst_17 = arith.constant 1.000000e+00 : f32
    %cst_18 = arith.constant 0.000000e+00 : f32
    %29 = vector.broadcast %cst_17 : f32 to vector<32x128xf32>
    %30 = vector.broadcast %cst_18 : f32 to vector<32x128xf32>
    %31 = arith.select %28, %29, %30 : vector<32x128xi1>, vector<32x128xf32>
    %32 = arith.truncf %31 : vector<32x128xf32> to vector<32x128xbf16>
    %c0_19 = arith.constant 0 : index
    %c0_20 = arith.constant 0 : index
    %c0_21 = arith.constant 0 : index
    %33 = vector.load %arg6[%c0_19, %c0_20, %c0_21] : memref<8x32x128xbf16, #tpu.memory_space<vmem>>, vector<1x32x128xbf16>
    %34 = vector.shape_cast %33 : vector<1x32x128xbf16> to vector<32x128xbf16>
    %35 = vector.shape_cast %32 : vector<32x128xbf16> to vector<1x32x128xbf16>
    tpu.vector_store %arg6[%c0_19, %c0_20, %c0_21], %35 {strides = array<i32>} : memref<8x32x128xbf16, #tpu.memory_space<vmem>>, vector<1x32x128xbf16>,
    %36 = vector.shape_cast %31 : vector<32x128xf32> to vector<1x32x128xf32>
    %cst_22 = arith.constant dense<0.000000e+00> : vector<1xf32>
    %37 = vector.multi_reduction <add>, %36, %cst_22 [1, 2] : vector<1x32x128xf32> to vector<1xf32>
    %38 = vector.shape_cast %37 : vector<1xf32> to vector<1x1x1xf32>
    %39 = vector.extract %38[0, 0, 0] : f32 from vector<1x1x1xf32>
    %40 = arith.addf %14, %39 : f32
    %41 = arith.maximumf %15, %39 : f32
    %c1_23 = arith.constant 1 : index
    %c0_24 = arith.constant 0 : index
    %c0_25 = arith.constant 0 : index
    %42 = vector.load %arg2[%c1_23, %c0_24, %c0_25] : memref<8x32x128xf32, #tpu.memory_space<vmem>>, vector<1x32x128xf32>
    %43 = vector.shape_cast %42 : vector<1x32x128xf32> to vector<32x128xf32>
    %cst_26 = arith.constant dense<0.000000e+00> : vector<32x128xf32>
    %44 = tpu.matmul %31, %5, %cst_26 {dimension_numbers = #tpu.dot_dimension_numbers<[1], [0], [0], [1], [0, 0, 1, 1], [], []>} : vector<32x128xf32>, vector<128x128xf32>, vector<32x128xf32> -> vector<32x128xf32>
    %45 = arith.subf %24, %44 : vector<32x128xf32>
    %46 = vector.broadcast %3 : f32 to vector<32x128xf32>
    %47 = arith.mulf %45, %46 : vector<32x128xf32>
    %48 = vector.broadcast %4 : f32 to vector<32x128xf32>
    %49 = arith.mulf %43, %48 : vector<32x128xf32>
    %50 = arith.addf %47, %49 : vector<32x128xf32>
    %51 = arith.mulf %50, %8 : vector<32x128xf32>
    %52 = arith.subf %51, %11 : vector<32x128xf32>
    %cst_27 = arith.constant 0.000000e+00 : f32
    %53 = vector.broadcast %cst_27 : f32 to vector<32x128xf32>
    %54 = arith.cmpf ogt, %52, %53 : vector<32x128xf32>
    %cst_28 = arith.constant 1.000000e+00 : f32
    %cst_29 = arith.constant 0.000000e+00 : f32
    %55 = vector.broadcast %cst_28 : f32 to vector<32x128xf32>
    %56 = vector.broadcast %cst_29 : f32 to vector<32x128xf32>
    %57 = arith.select %54, %55, %56 : vector<32x128xi1>, vector<32x128xf32>
    %58 = arith.truncf %57 : vector<32x128xf32> to vector<32x128xbf16>
    %c1_30 = arith.constant 1 : index
    %c0_31 = arith.constant 0 : index
    %c0_32 = arith.constant 0 : index
    %59 = vector.load %arg6[%c1_30, %c0_31, %c0_32] : memref<8x32x128xbf16, #tpu.memory_space<vmem>>, vector<1x32x128xbf16>
    %60 = vector.shape_cast %59 : vector<1x32x128xbf16> to vector<32x128xbf16>
    %61 = vector.shape_cast %58 : vector<32x128xbf16> to vector<1x32x128xbf16>
    tpu.vector_store %arg6[%c1_30, %c0_31, %c0_32], %61 {strides = array<i32>} : memref<8x32x128xbf16, #tpu.memory_space<vmem>>, vector<1x32x128xbf16>,
    %62 = vector.shape_cast %57 : vector<32x128xf32> to vector<1x32x128xf32>
    %cst_33 = arith.constant dense<0.000000e+00> : vector<1xf32>
    %63 = vector.multi_reduction <add>, %62, %cst_33 [1, 2] : vector<1x32x128xf32> to vector<1xf32>
    %64 = vector.shape_cast %63 : vector<1xf32> to vector<1x1x1xf32>
    %65 = vector.extract %64[0, 0, 0] : f32 from vector<1x1x1xf32>
    %66 = arith.addf %40, %65 : f32
    %67 = arith.maximumf %41, %65 : f32
    %c2 = arith.constant 2 : index
    %c0_34 = arith.constant 0 : index
    %c0_35 = arith.constant 0 : index
    %68 = vector.load %arg2[%c2, %c0_34, %c0_35] : memref<8x32x128xf32, #tpu.memory_space<vmem>>, vector<1x32x128xf32>
    %69 = vector.shape_cast %68 : vector<1x32x128xf32> to vector<32x128xf32>
    %cst_36 = arith.constant dense<0.000000e+00> : vector<32x128xf32>
    %70 = tpu.matmul %57, %5, %cst_36 {dimension_numbers = #tpu.dot_dimension_numbers<[1], [0], [0], [1], [0, 0, 1, 1], [], []>} : vector<32x128xf32>, vector<128x128xf32>, vector<32x128xf32> -> vector<32x128xf32>
    %71 = arith.subf %50, %70 : vector<32x128xf32>
    %72 = vector.broadcast %3 : f32 to vector<32x128xf32>
    %73 = arith.mulf %71, %72 : vector<32x128xf32>
    %74 = vector.broadcast %4 : f32 to vector<32x128xf32>
    %75 = arith.mulf %69, %74 : vector<32x128xf32>
    %76 = arith.addf %73, %75 : vector<32x128xf32>
    %77 = arith.mulf %76, %8 : vector<32x128xf32>
    %78 = arith.subf %77, %11 : vector<32x128xf32>
    %cst_37 = arith.constant 0.000000e+00 : f32
    %79 = vector.broadcast %cst_37 : f32 to vector<32x128xf32>
    %80 = arith.cmpf ogt, %78, %79 : vector<32x128xf32>
    %cst_38 = arith.constant 1.000000e+00 : f32
    %cst_39 = arith.constant 0.000000e+00 : f32
    %81 = vector.broadcast %cst_38 : f32 to vector<32x128xf32>
    %82 = vector.broadcast %cst_39 : f32 to vector<32x128xf32>
    %83 = arith.select %80, %81, %82 : vector<32x128xi1>, vector<32x128xf32>
    %84 = arith.truncf %83 : vector<32x128xf32> to vector<32x128xbf16>
    %c2_40 = arith.constant 2 : index
    %c0_41 = arith.constant 0 : index
    %c0_42 = arith.constant 0 : index
    %85 = vector.load %arg6[%c2_40, %c0_41, %c0_42] : memref<8x32x128xbf16, #tpu.memory_space<vmem>>, vector<1x32x128xbf16>
    %86 = vector.shape_cast %85 : vector<1x32x128xbf16> to vector<32x128xbf16>
    %87 = vector.shape_cast %84 : vector<32x128xbf16> to vector<1x32x128xbf16>
    tpu.vector_store %arg6[%c2_40, %c0_41, %c0_42], %87 {strides = array<i32>} : memref<8x32x128xbf16, #tpu.memory_space<vmem>>, vector<1x32x128xbf16>,
    %88 = vector.shape_cast %83 : vector<32x128xf32> to vector<1x32x128xf32>
    %cst_43 = arith.constant dense<0.000000e+00> : vector<1xf32>
    %89 = vector.multi_reduction <add>, %88, %cst_43 [1, 2] : vector<1x32x128xf32> to vector<1xf32>
    %90 = vector.shape_cast %89 : vector<1xf32> to vector<1x1x1xf32>
    %91 = vector.extract %90[0, 0, 0] : f32 from vector<1x1x1xf32>
    %92 = arith.addf %66, %91 : f32
    %93 = arith.maximumf %67, %91 : f32
    %c3 = arith.constant 3 : index
    %c0_44 = arith.constant 0 : index
    %c0_45 = arith.constant 0 : index
    %94 = vector.load %arg2[%c3, %c0_44, %c0_45] : memref<8x32x128xf32, #tpu.memory_space<vmem>>, vector<1x32x128xf32>
    %95 = vector.shape_cast %94 : vector<1x32x128xf32> to vector<32x128xf32>
    %cst_46 = arith.constant dense<0.000000e+00> : vector<32x128xf32>
    %96 = tpu.matmul %83, %5, %cst_46 {dimension_numbers = #tpu.dot_dimension_numbers<[1], [0], [0], [1], [0, 0, 1, 1], [], []>} : vector<32x128xf32>, vector<128x128xf32>, vector<32x128xf32> -> vector<32x128xf32>
    %97 = arith.subf %76, %96 : vector<32x128xf32>
    %98 = vector.broadcast %3 : f32 to vector<32x128xf32>
    %99 = arith.mulf %97, %98 : vector<32x128xf32>
    %100 = vector.broadcast %4 : f32 to vector<32x128xf32>
    %101 = arith.mulf %95, %100 : vector<32x128xf32>
    %102 = arith.addf %99, %101 : vector<32x128xf32>
    %103 = arith.mulf %102, %8 : vector<32x128xf32>
    %104 = arith.subf %103, %11 : vector<32x128xf32>
    %cst_47 = arith.constant 0.000000e+00 : f32
    %105 = vector.broadcast %cst_47 : f32 to vector<32x128xf32>
    %106 = arith.cmpf ogt, %104, %105 : vector<32x128xf32>
    %cst_48 = arith.constant 1.000000e+00 : f32
    %cst_49 = arith.constant 0.000000e+00 : f32
    %107 = vector.broadcast %cst_48 : f32 to vector<32x128xf32>
    %108 = vector.broadcast %cst_49 : f32 to vector<32x128xf32>
    %109 = arith.select %106, %107, %108 : vector<32x128xi1>, vector<32x128xf32>
    %110 = arith.truncf %109 : vector<32x128xf32> to vector<32x128xbf16>
    %c3_50 = arith.constant 3 : index
    %c0_51 = arith.constant 0 : index
    %c0_52 = arith.constant 0 : index
    %111 = vector.load %arg6[%c3_50, %c0_51, %c0_52] : memref<8x32x128xbf16, #tpu.memory_space<vmem>>, vector<1x32x128xbf16>
    %112 = vector.shape_cast %111 : vector<1x32x128xbf16> to vector<32x128xbf16>
    %113 = vector.shape_cast %110 : vector<32x128xbf16> to vector<1x32x128xbf16>
    tpu.vector_store %arg6[%c3_50, %c0_51, %c0_52], %113 {strides = array<i32>} : memref<8x32x128xbf16, #tpu.memory_space<vmem>>, vector<1x32x128xbf16>,
    %114 = vector.shape_cast %109 : vector<32x128xf32> to vector<1x32x128xf32>
    %cst_53 = arith.constant dense<0.000000e+00> : vector<1xf32>
    %115 = vector.multi_reduction <add>, %114, %cst_53 [1, 2] : vector<1x32x128xf32> to vector<1xf32>
    %116 = vector.shape_cast %115 : vector<1xf32> to vector<1x1x1xf32>
    %117 = vector.extract %116[0, 0, 0] : f32 from vector<1x1x1xf32>
    %118 = arith.addf %92, %117 : f32
    %119 = arith.maximumf %93, %117 : f32
    %c4 = arith.constant 4 : index
    %c0_54 = arith.constant 0 : index
    %c0_55 = arith.constant 0 : index
    %120 = vector.load %arg2[%c4, %c0_54, %c0_55] : memref<8x32x128xf32, #tpu.memory_space<vmem>>, vector<1x32x128xf32>
    %121 = vector.shape_cast %120 : vector<1x32x128xf32> to vector<32x128xf32>
    %cst_56 = arith.constant dense<0.000000e+00> : vector<32x128xf32>
    %122 = tpu.matmul %109, %5, %cst_56 {dimension_numbers = #tpu.dot_dimension_numbers<[1], [0], [0], [1], [0, 0, 1, 1], [], []>} : vector<32x128xf32>, vector<128x128xf32>, vector<32x128xf32> -> vector<32x128xf32>
    %123 = arith.subf %102, %122 : vector<32x128xf32>
    %124 = vector.broadcast %3 : f32 to vector<32x128xf32>
    %125 = arith.mulf %123, %124 : vector<32x128xf32>
    %126 = vector.broadcast %4 : f32 to vector<32x128xf32>
    %127 = arith.mulf %121, %126 : vector<32x128xf32>
    %128 = arith.addf %125, %127 : vector<32x128xf32>
    %129 = arith.mulf %128, %8 : vector<32x128xf32>
    %130 = arith.subf %129, %11 : vector<32x128xf32>
    %cst_57 = arith.constant 0.000000e+00 : f32
    %131 = vector.broadcast %cst_57 : f32 to vector<32x128xf32>
    %132 = arith.cmpf ogt, %130, %131 : vector<32x128xf32>
    %cst_58 = arith.constant 1.000000e+00 : f32
    %cst_59 = arith.constant 0.000000e+00 : f32
    %133 = vector.broadcast %cst_58 : f32 to vector<32x128xf32>
    %134 = vector.broadcast %cst_59 : f32 to vector<32x128xf32>
    %135 = arith.select %132, %133, %134 : vector<32x128xi1>, vector<32x128xf32>
    %136 = arith.truncf %135 : vector<32x128xf32> to vector<32x128xbf16>
    %c4_60 = arith.constant 4 : index
    %c0_61 = arith.constant 0 : index
    %c0_62 = arith.constant 0 : index
    %137 = vector.load %arg6[%c4_60, %c0_61, %c0_62] : memref<8x32x128xbf16, #tpu.memory_space<vmem>>, vector<1x32x128xbf16>
    %138 = vector.shape_cast %137 : vector<1x32x128xbf16> to vector<32x128xbf16>
    %139 = vector.shape_cast %136 : vector<32x128xbf16> to vector<1x32x128xbf16>
    tpu.vector_store %arg6[%c4_60, %c0_61, %c0_62], %139 {strides = array<i32>} : memref<8x32x128xbf16, #tpu.memory_space<vmem>>, vector<1x32x128xbf16>,
    %140 = vector.shape_cast %135 : vector<32x128xf32> to vector<1x32x128xf32>
    %cst_63 = arith.constant dense<0.000000e+00> : vector<1xf32>
    %141 = vector.multi_reduction <add>, %140, %cst_63 [1, 2] : vector<1x32x128xf32> to vector<1xf32>
    %142 = vector.shape_cast %141 : vector<1xf32> to vector<1x1x1xf32>
    %143 = vector.extract %142[0, 0, 0] : f32 from vector<1x1x1xf32>
    %144 = arith.addf %118, %143 : f32
    %145 = arith.maximumf %119, %143 : f32
    %c5 = arith.constant 5 : index
    %c0_64 = arith.constant 0 : index
    %c0_65 = arith.constant 0 : index
    %146 = vector.load %arg2[%c5, %c0_64, %c0_65] : memref<8x32x128xf32, #tpu.memory_space<vmem>>, vector<1x32x128xf32>
    %147 = vector.shape_cast %146 : vector<1x32x128xf32> to vector<32x128xf32>
    %cst_66 = arith.constant dense<0.000000e+00> : vector<32x128xf32>
    %148 = tpu.matmul %135, %5, %cst_66 {dimension_numbers = #tpu.dot_dimension_numbers<[1], [0], [0], [1], [0, 0, 1, 1], [], []>} : vector<32x128xf32>, vector<128x128xf32>, vector<32x128xf32> -> vector<32x128xf32>
    %149 = arith.subf %128, %148 : vector<32x128xf32>
    %150 = vector.broadcast %3 : f32 to vector<32x128xf32>
    %151 = arith.mulf %149, %150 : vector<32x128xf32>
    %152 = vector.broadcast %4 : f32 to vector<32x128xf32>
    %153 = arith.mulf %147, %152 : vector<32x128xf32>
    %154 = arith.addf %151, %153 : vector<32x128xf32>
    %155 = arith.mulf %154, %8 : vector<32x128xf32>
    %156 = arith.subf %155, %11 : vector<32x128xf32>
    %cst_67 = arith.constant 0.000000e+00 : f32
    %157 = vector.broadcast %cst_67 : f32 to vector<32x128xf32>
    %158 = arith.cmpf ogt, %156, %157 : vector<32x128xf32>
    %cst_68 = arith.constant 1.000000e+00 : f32
    %cst_69 = arith.constant 0.000000e+00 : f32
    %159 = vector.broadcast %cst_68 : f32 to vector<32x128xf32>
    %160 = vector.broadcast %cst_69 : f32 to vector<32x128xf32>
    %161 = arith.select %158, %159, %160 : vector<32x128xi1>, vector<32x128xf32>
    %162 = arith.truncf %161 : vector<32x128xf32> to vector<32x128xbf16>
    %c5_70 = arith.constant 5 : index
    %c0_71 = arith.constant 0 : index
    %c0_72 = arith.constant 0 : index
    %163 = vector.load %arg6[%c5_70, %c0_71, %c0_72] : memref<8x32x128xbf16, #tpu.memory_space<vmem>>, vector<1x32x128xbf16>
    %164 = vector.shape_cast %163 : vector<1x32x128xbf16> to vector<32x128xbf16>
    %165 = vector.shape_cast %162 : vector<32x128xbf16> to vector<1x32x128xbf16>
    tpu.vector_store %arg6[%c5_70, %c0_71, %c0_72], %165 {strides = array<i32>} : memref<8x32x128xbf16, #tpu.memory_space<vmem>>, vector<1x32x128xbf16>,
    %166 = vector.shape_cast %161 : vector<32x128xf32> to vector<1x32x128xf32>
    %cst_73 = arith.constant dense<0.000000e+00> : vector<1xf32>
    %167 = vector.multi_reduction <add>, %166, %cst_73 [1, 2] : vector<1x32x128xf32> to vector<1xf32>
    %168 = vector.shape_cast %167 : vector<1xf32> to vector<1x1x1xf32>
    %169 = vector.extract %168[0, 0, 0] : f32 from vector<1x1x1xf32>
    %170 = arith.addf %144, %169 : f32
    %171 = arith.maximumf %145, %169 : f32
    %c6 = arith.constant 6 : index
    %c0_74 = arith.constant 0 : index
    %c0_75 = arith.constant 0 : index
    %172 = vector.load %arg2[%c6, %c0_74, %c0_75] : memref<8x32x128xf32, #tpu.memory_space<vmem>>, vector<1x32x128xf32>
    %173 = vector.shape_cast %172 : vector<1x32x128xf32> to vector<32x128xf32>
    %cst_76 = arith.constant dense<0.000000e+00> : vector<32x128xf32>
    %174 = tpu.matmul %161, %5, %cst_76 {dimension_numbers = #tpu.dot_dimension_numbers<[1], [0], [0], [1], [0, 0, 1, 1], [], []>} : vector<32x128xf32>, vector<128x128xf32>, vector<32x128xf32> -> vector<32x128xf32>
    %175 = arith.subf %154, %174 : vector<32x128xf32>
    %176 = vector.broadcast %3 : f32 to vector<32x128xf32>
    %177 = arith.mulf %175, %176 : vector<32x128xf32>
    %178 = vector.broadcast %4 : f32 to vector<32x128xf32>
    %179 = arith.mulf %173, %178 : vector<32x128xf32>
    %180 = arith.addf %177, %179 : vector<32x128xf32>
    %181 = arith.mulf %180, %8 : vector<32x128xf32>
    %182 = arith.subf %181, %11 : vector<32x128xf32>
    %cst_77 = arith.constant 0.000000e+00 : f32
    %183 = vector.broadcast %cst_77 : f32 to vector<32x128xf32>
    %184 = arith.cmpf ogt, %182, %183 : vector<32x128xf32>
    %cst_78 = arith.constant 1.000000e+00 : f32
    %cst_79 = arith.constant 0.000000e+00 : f32
    %185 = vector.broadcast %cst_78 : f32 to vector<32x128xf32>
    %186 = vector.broadcast %cst_79 : f32 to vector<32x128xf32>
    %187 = arith.select %184, %185, %186 : vector<32x128xi1>, vector<32x128xf32>
    %188 = arith.truncf %187 : vector<32x128xf32> to vector<32x128xbf16>
    %c6_80 = arith.constant 6 : index
    %c0_81 = arith.constant 0 : index
    %c0_82 = arith.constant 0 : index
    %189 = vector.load %arg6[%c6_80, %c0_81, %c0_82] : memref<8x32x128xbf16, #tpu.memory_space<vmem>>, vector<1x32x128xbf16>
    %190 = vector.shape_cast %189 : vector<1x32x128xbf16> to vector<32x128xbf16>
    %191 = vector.shape_cast %188 : vector<32x128xbf16> to vector<1x32x128xbf16>
    tpu.vector_store %arg6[%c6_80, %c0_81, %c0_82], %191 {strides = array<i32>} : memref<8x32x128xbf16, #tpu.memory_space<vmem>>, vector<1x32x128xbf16>,
    %192 = vector.shape_cast %187 : vector<32x128xf32> to vector<1x32x128xf32>
    %cst_83 = arith.constant dense<0.000000e+00> : vector<1xf32>
    %193 = vector.multi_reduction <add>, %192, %cst_83 [1, 2] : vector<1x32x128xf32> to vector<1xf32>
    %194 = vector.shape_cast %193 : vector<1xf32> to vector<1x1x1xf32>
    %195 = vector.extract %194[0, 0, 0] : f32 from vector<1x1x1xf32>
    %196 = arith.addf %170, %195 : f32
    %197 = arith.maximumf %171, %195 : f32
    %c7 = arith.constant 7 : index
    %c0_84 = arith.constant 0 : index
    %c0_85 = arith.constant 0 : index
    %198 = vector.load %arg2[%c7, %c0_84, %c0_85] : memref<8x32x128xf32, #tpu.memory_space<vmem>>, vector<1x32x128xf32>
    %199 = vector.shape_cast %198 : vector<1x32x128xf32> to vector<32x128xf32>
    %cst_86 = arith.constant dense<0.000000e+00> : vector<32x128xf32>
    %200 = tpu.matmul %187, %5, %cst_86 {dimension_numbers = #tpu.dot_dimension_numbers<[1], [0], [0], [1], [0, 0, 1, 1], [], []>} : vector<32x128xf32>, vector<128x128xf32>, vector<32x128xf32> -> vector<32x128xf32>
    %201 = arith.subf %180, %200 : vector<32x128xf32>
    %202 = vector.broadcast %3 : f32 to vector<32x128xf32>
    %203 = arith.mulf %201, %202 : vector<32x128xf32>
    %204 = vector.broadcast %4 : f32 to vector<32x128xf32>
    %205 = arith.mulf %199, %204 : vector<32x128xf32>
    %206 = arith.addf %203, %205 : vector<32x128xf32>
    %207 = arith.mulf %206, %8 : vector<32x128xf32>
    %208 = arith.subf %207, %11 : vector<32x128xf32>
    %cst_87 = arith.constant 0.000000e+00 : f32
    %209 = vector.broadcast %cst_87 : f32 to vector<32x128xf32>
    %210 = arith.cmpf ogt, %208, %209 : vector<32x128xf32>
    %cst_88 = arith.constant 1.000000e+00 : f32
    %cst_89 = arith.constant 0.000000e+00 : f32
    %211 = vector.broadcast %cst_88 : f32 to vector<32x128xf32>
    %212 = vector.broadcast %cst_89 : f32 to vector<32x128xf32>
    %213 = arith.select %210, %211, %212 : vector<32x128xi1>, vector<32x128xf32>
    %214 = arith.truncf %213 : vector<32x128xf32> to vector<32x128xbf16>
    %c7_90 = arith.constant 7 : index
    %c0_91 = arith.constant 0 : index
    %c0_92 = arith.constant 0 : index
    %215 = vector.load %arg6[%c7_90, %c0_91, %c0_92] : memref<8x32x128xbf16, #tpu.memory_space<vmem>>, vector<1x32x128xbf16>
    %216 = vector.shape_cast %215 : vector<1x32x128xbf16> to vector<32x128xbf16>
    %217 = vector.shape_cast %214 : vector<32x128xbf16> to vector<1x32x128xbf16>
    tpu.vector_store %arg6[%c7_90, %c0_91, %c0_92], %217 {strides = array<i32>} : memref<8x32x128xbf16, #tpu.memory_space<vmem>>, vector<1x32x128xbf16>,
    %218 = vector.shape_cast %213 : vector<32x128xf32> to vector<1x32x128xf32>
    %cst_93 = arith.constant dense<0.000000e+00> : vector<1xf32>
    %219 = vector.multi_reduction <add>, %218, %cst_93 [1, 2] : vector<1x32x128xf32> to vector<1xf32>
    %220 = vector.shape_cast %219 : vector<1xf32> to vector<1x1x1xf32>
    %221 = vector.extract %220[0, 0, 0] : f32 from vector<1x1x1xf32>
    %222 = arith.addf %196, %221 : f32
    %223 = arith.maximumf %197, %221 : f32
    %c0_94 = arith.constant 0 : index
    %c0_95 = arith.constant 0 : index
    %224 = vector.load %arg8[%c0_94, %c0_95] : memref<32x128xf32, #tpu.memory_space<vmem>>, vector<32x128xf32>
    tpu.vector_store %arg8[%c0_94, %c0_95], %206 {strides = array<i32>} : memref<32x128xf32, #tpu.memory_space<vmem>>, vector<32x128xf32>,
    %c0_96 = arith.constant 0 : index
    %c0_97 = arith.constant 0 : index
    %225 = vector.load %arg9[%c0_96, %c0_97] : memref<32x128xf32, #tpu.memory_space<vmem>>, vector<32x128xf32>
    tpu.vector_store %arg9[%c0_96, %c0_97], %213 {strides = array<i32>} : memref<32x128xf32, #tpu.memory_space<vmem>>, vector<32x128xf32>,
    %c0_98 = arith.constant 0 : index
    %226 = memref.load %arg10[%c0_98] : memref<2xf32, #tpu.memory_space<smem>>
    memref.store %222, %arg10[%c0_98] : memref<2xf32, #tpu.memory_space<smem>>
    %c1_99 = arith.constant 1 : index
    %227 = memref.load %arg10[%c1_99] : memref<2xf32, #tpu.memory_space<smem>>
    memref.store %223, %arg10[%c1_99] : memref<2xf32, #tpu.memory_space<smem>>
    %c1_i32 = arith.constant 1 : i32
    %228 = arith.cmpi eq, %arg0, %c1_i32 : i32
    %229 = arith.extui %228 : i1 to i32
    %c0_i32_100 = arith.constant 0 : i32
    %230 = arith.cmpi ne, %229, %c0_i32_100 : i32
    scf.if %230 {
      %231 = tpu.iota {dimensions = array<i32: 1>} : vector<1x128xi32>
      %c0_i32_101 = arith.constant 0 : i32
      %232 = vector.broadcast %c0_i32_101 : i32 to vector<1x128xi32>
      %233 = arith.cmpi eq, %231, %232 : vector<1x128xi32>
      %c1_i32_102 = arith.constant 1 : i32
      %234 = vector.broadcast %c1_i32_102 : i32 to vector<1x128xi32>
      %235 = arith.cmpi eq, %231, %234 : vector<1x128xi32>
      %cst_103 = arith.constant 0.000000e+00 : f32
      %236 = vector.broadcast %223 : f32 to vector<1x128xf32>
      %237 = vector.broadcast %cst_103 : f32 to vector<1x128xf32>
      %238 = arith.select %235, %236, %237 : vector<1x128xi1>, vector<1x128xf32>
      %239 = vector.broadcast %222 : f32 to vector<1x128xf32>
      %240 = arith.select %233, %239, %238 : vector<1x128xi1>, vector<1x128xf32>
      %c0_104 = arith.constant 0 : index
      %c0_105 = arith.constant 0 : index
      %241 = vector.load %arg7[%c0_104, %c0_105] : memref<1x128xf32, #tpu.memory_space<vmem>>, vector<1x128xf32>
      tpu.vector_store %arg7[%c0_104, %c0_105], %240 {strides = array<i32>} : memref<1x128xf32, #tpu.memory_space<vmem>>, vector<1x128xf32>,
    } else {
    }
    return
  }
  func.func @transform_0(%arg0: i32) -> i32 {
    %c0_i32 = arith.constant 0 : i32
    %c0_i32_0 = arith.constant 0 : i32
    return %c0_i32 : i32
  }
  func.func @transform_1(%arg0: i32) -> (i32, i32, i32) {
    %c0_i32 = arith.constant 0 : i32
    %c0_i32_0 = arith.constant 0 : i32
    %c0_i32_1 = arith.constant 0 : i32
    return %arg0, %c0_i32, %c0_i32_0 : i32, i32, i32
  }
  func.func @transform_2(%arg0: i32) -> (i32, i32) {
    %c0_i32 = arith.constant 0 : i32
    %c0_i32_0 = arith.constant 0 : i32
    %c0_i32_1 = arith.constant 0 : i32
    return %c0_i32, %c0_i32_0 : i32, i32
  }
  func.func @transform_3(%arg0: i32) -> (i32, i32) {
    %c0_i32 = arith.constant 0 : i32
    %c0_i32_0 = arith.constant 0 : i32
    %c0_i32_1 = arith.constant 0 : i32
    return %c0_i32, %c0_i32_0 : i32, i32
  }
  func.func @transform_4(%arg0: i32) -> (i32, i32) {
    %c0_i32 = arith.constant 0 : i32
    %c0_i32_0 = arith.constant 0 : i32
    %c0_i32_1 = arith.constant 0 : i32
    return %c0_i32, %c0_i32_0 : i32, i32
  }
  func.func @transform_5(%arg0: i32) -> (i32, i32, i32) {
    %c0_i32 = arith.constant 0 : i32
    %c0_i32_0 = arith.constant 0 : i32
    %c0_i32_1 = arith.constant 0 : i32
    return %arg0, %c0_i32, %c0_i32_0 : i32, i32, i32
  }
  func.func @transform_6(%arg0: i32) -> (i32, i32) {
    %c0_i32 = arith.constant 0 : i32
    %c0_i32_0 = arith.constant 0 : i32
    %c0_i32_1 = arith.constant 0 : i32
    return %c0_i32, %c0_i32_0 : i32, i32
  }
}

</mosaic_0001>

<bundles_post_ra>
// kernel: spiking_conv2d_forward.1
= control target key start
LH: loop header
LB: loop body
LE: loop exit
PB: predicated region body
PF: predicated region fallthrough
CT: control target
= control target key end

     0   :  { %s3325_s0 = inlined_call_operand.vmem [shape: f32[2], index: 0, kind: input, shape index: {}]   ;;  %s3326_s1 = inlined_call_operand.vmem [shape: f32[16,32,128], index: 1, kind: input, shape index: {}]   ;;  %s3327_s2 = inlined_call_operand.vmem [shape: f32[128,128], index: 2, kind: input, shape index: {}]   ;;  %s3328_s3 = inlined_call_operand.vmem [shape: f32[1,128], index: 3, kind: input, shape index: {}]   ;;  %s3329_s4 = inlined_call_operand.vmem [shape: f32[1,128], index: 4, kind: input, shape index: {}]   ;;  %s3330_s5 = inlined_call_operand.vmem [shape: bf16[16,32,128], index: 5, kind: output, shape index: {0}]   ;;  %s3331_s6 = inlined_call_operand.vmem [shape: f32[1,128], index: 6, kind: output, shape index: {1}]  }
   0x1   :  { %3332 = sst [smem:[#allocation8_spill]] %s3325_s0 }
   0x2   :  { %3333 = sst [smem:[#allocation9_spill]] %s3326_s1 }
   0x3   :  { %3334 = sst [smem:[#allocation10_spill]] %s3327_s2 }
   0x4   :  { %12 = vsyncpa [#allocation6], 0  ;;  %s2750_s21 = smov 0  }
   0x5 LB: > { %s2756_s22 = sadd.s32 4294967295, %s2708_s21   ;;  %p1690_p0 = scmp.ge.s32.totalorder %s2708_s21, 1  ;;  %s2708_s21 = sphi %s2750_s21, %s18_s21  }
   0x6   : > { %p180_p1 = scmp.lt.s32.totalorder %s2708_s21, 3  ;;  %s3335_s0 = sld [smem:[#allocation8_spill]] }
   0x7   : > { %p2666_p4 = scmp.eq.s32.totalorder %s2756_s22, 0 }
   0x8   : > { %p2764_p3 = pnand %p1690_p0, %p180_p1 }
   0xa   : > { %p2662_p5 = pneg %p2764_p3 }
   0xc   : > { %s193_s25 = sshll.u32 %s3335_s0, 4  ;;  %p2663_p6 = pnand %p2666_p4, %p2662_p5  ;;  %s194_s25 = int_to_ptr.vmem [resolvable:$true] %s193_s25 }
   0xd   : > { %s2683_s27 = scalar_lea.vmem %s194_s25, 16  ;;  %p2691_p11 = scmp.lt.s32.totalorder %s194_s25, %s194_s25 }
   0xe   : > { %p2684_p7 = scmp.ne.s32.totalorder %s194_s25, %s2683_s27  ;;  %p2685_p8 = pneg %p2663_p6 }
   0xf   : > { %p2692_p12 = scmp.lt.s32.totalorder %s2683_s27, %s2683_s27 }
  0x10   : > { %p2686_p9 = pnand %p2685_p8, %p2684_p7 }
  0x11   : > { %p2693_p13 = por %p2692_p12, %p2691_p11 }
  0x12   : > { %p2687_p10 = pneg %p2686_p9 }
  0x14   : > { %p2694_p2 = pnand %p2693_p13, %p2687_p10 }
  0x16   : > { %2697 = shalt.err (!%p2694_p2)
}
  0x17   : > { %s2710_s28 = smov [#allocation5]   ;;  %225 = sbr.rel (%p2764_p3) target bundleno = 2101 (0x835), region = 40 }
  0x18   : > { %2665 = dma.vmem_to_smem (!%p2663_p6), %s194_s25, 16, %s2710_s28, [#allocation6]  }
  0x1e   : > { %2703 = dma.done.wait (%p2666_p4), [#allocation6], 16  }
  0x1f   : > { %2705 = vsyncadd (%p2666_p4), [#allocation6], 4294967280 }
  0x20   : > { %231 = sfence }
  0x21   : > { %s1695_s29 = sshll.u32 %s2756_s22, 3  ;;  %s3337_s1 = sld [smem:[#allocation9_spill]] }
  0x22   : > { %p259_p0 = scmp.lt.s32.totalorder %s1695_s29, 15  ;;  %p3338_p1 = scmp.ne.s32.totalorder %s2756_s22, 0 }
  0x23   : > { %v2711_v0 = vmov (!%p3338_p1), 0.0   ;;  %s2712_s16 = smov (!%p3338_p1), 0.0  }
  0x24   : > { %s3341_s29 = smov (!%p259_p0, %s1695_s29), 15  ;;  %275 = sbr.rel (%p3338_p1) target bundleno = 43 (0x2b), region = 48 }
  0x25   : > { %s1825_s30 = sshll.u32 %s3341_s29, 5  ;;  %s1826_s7 = sshll.u32 %s3341_s29, 4  ;;  %276 = vst [vmem:[#allocation2] sm:$0xff] (!%p3338_p1), %v2711_v0  ;;  %277 = vst [vmem:[#allocation2 + $0x8] sm:$0xff] (!%p3338_p1), %v2711_v0 }
  0x26   : > { %s2788_s13 = scalar_lea.vmem %s3330_s5, %s1826_s7  ;;  %278 = vst [vmem:[#allocation2 + $0x10] sm:$0xff] (!%p3338_p1), %v2711_v0  ;;  %279 = vst [vmem:[#allocation2 + $0x18] sm:$0xff] (!%p3338_p1), %v2711_v0  ;;  %285 = sst [smem:[#allocation4]] (!%p3338_p1), %s2712_s16 }
  0x27   : > { %s2783_s10 = scalar_lea.vmem %s3337_s1, %s1825_s30  ;;  %280 = vst [vmem:[#allocation3] sm:$0xff] (!%p3338_p1), %v2711_v0  ;;  %281 = vst [vmem:[#allocation3 + $0x8] sm:$0xff] (!%p3338_p1), %v2711_v0  ;;  %287 = sst [smem:[#allocation4 + $0x1]] (!%p3338_p1), %s2712_s16 }
  0x28   : > { %282 = vst [vmem:[#allocation3 + $0x10] sm:$0xff] (!%p3338_p1), %v2711_v0  ;;  %283 = vst [vmem:[#allocation3 + $0x18] sm:$0xff] (!%p3338_p1), %v2711_v0 }
  0x29   : > { %288 = vst [vmem:[%s3331_s6] sm:$0x1] (!%p3338_p1), %v2711_v0 }
  0x2b PF: > { %s3339_s2 = sld [smem:[#allocation10_spill]]  ;;  %s1702_s7 = sld [smem:[#allocation5 + $0x1]]  ;;  %v332_v30 = vld [vmem:[%s2783_s10 + $0x8] sm:$0xff]  ;;  %v331_v33 = vld [vmem:[%s2783_s10] sm:$0xff]  ;;  %v334_v42 = vld [vmem:[%s2783_s10 + $0x18] sm:$0xff] }
  0x2c   : > { %s289_s8 = sld [smem:[#allocation5]]  ;;  %v322_v29 = vld [vmem:[#allocation2 + $0x8] sm:$0xff]  ;;  %v321_v32 = vld [vmem:[#allocation2] sm:$0xff]  ;;  %v333_v45 = vld [vmem:[%s2783_s10 + $0x10] sm:$0xff]  ;;  %s329_s18 = sld [smem:[#allocation4]] }
  0x2d   : > { %v324_v41 = vld [vmem:[#allocation2 + $0x18] sm:$0xff]  ;;  %v323_v44 = vld [vmem:[#allocation2 + $0x10] sm:$0xff]  ;;  %v2923_v46 = vld [vmem:[%s3328_s3] ss:$0 sm:$0xff]  ;;  %s1705_s20 = sld [smem:[#allocation4 + $0x1]]  ;;  %p1822_p2 = scmp.ne.s32.totalorder %s2756_s22, 1 }
  0x2e   : > { %v325_v10 = vld [vmem:[#allocation3] sm:$0xff]  ;;  %v326_v26 = vld [vmem:[#allocation3 + $0x8] sm:$0xff] }
  0x2f   : > { %2114 = vmatprep.mubr.f32.mxu0 %v325_v10  ;;  %v327_v27 = vld [vmem:[#allocation3 + $0x10] sm:$0xff]  ;;  %v328_v28 = vld [vmem:[#allocation3 + $0x18] sm:$0xff]  ;;  %v2935_v56 = vld [vmem:[%s3329_s4] ss:$0 sm:$0xff] }
  0x31   : > { %v291_v1 = vld [vmem:[%s3339_s2] sm:$0xff]  ;;  %v292_v2 = vld [vmem:[%s3339_s2 + $0x8] sm:$0xff]  ;;  %v293_v3 = vld [vmem:[%s3339_s2 + $0x10] sm:$0xff]  ;;  %v2910_v31 = vstv %s1702_s7 }
  0x32   : > { %v2804_v4 = vpack.c.bf16 %v292_v2, %v291_v1  ;;  %v294_v5 = vld [vmem:[%s3339_s2 + $0x18] sm:$0xff]  ;;  %v295_v7 = vld [vmem:[%s3339_s2 + $0x20] sm:$0xff]  ;;  %v296_v8 = vld [vmem:[%s3339_s2 + $0x28] sm:$0xff]  ;;  %v2913_v35 = vstv %s289_s8  ;;  %v431_v37 = vmul.f32 %v2910_v31, %v332_v30  ;;  %v430_v40 = vmul.f32 %v2910_v31, %v331_v33 }
  0x33   : > { %v2809_v6 = vpack.c.bf16 %v294_v5, %v293_v3  ;;  %v2822_v9 = vpack.c.bf16 %v296_v8, %v295_v7  ;;  %v297_v11 = vld [vmem:[%s3339_s2 + $0x30] sm:$0xff]  ;;  %v298_v12 = vld [vmem:[%s3339_s2 + $0x38] sm:$0xff]  ;;  %v299_v14 = vld [vmem:[%s3339_s2 + $0x40] sm:$0xff]  ;;  %v433_v51 = vmul.f32 %v2910_v31, %v334_v42  ;;  %v432_v55 = vmul.f32 %v2910_v31, %v333_v45 }
  0x34   : > { %2387 = vmatprep.subr.bf16.mxu0 %v2804_v4  ;;  %2419 = vmatprep.subr.bf16.mxu1 %v2804_v4  ;;  %v2834_v13 = vpack.c.bf16 %v298_v12, %v297_v11  ;;  %v300_v15 = vld [vmem:[%s3339_s2 + $0x48] sm:$0xff]  ;;  %v301_v17 = vld [vmem:[%s3339_s2 + $0x50] sm:$0xff]  ;;  %v302_v18 = vld [vmem:[%s3339_s2 + $0x58] sm:$0xff]  ;;  %v2713_v2 = vmov 0.0   ;;  %v2714_v8 = vmov 1.0  }
  0x35   : > { %2389 = vmatpush3.bf16.msra.mxu0 %v2804_v4  ;;  %2421 = vmatpush3.bf16.msra.mxu1 %v2804_v4  ;;  %v2846_v16 = vpack.c.bf16 %v300_v15, %v299_v14  ;;  %v2858_v19 = vpack.c.bf16 %v302_v18, %v301_v17  ;;  %v303_v20 = vld [vmem:[%s3339_s2 + $0x60] sm:$0xff]  ;;  %v304_v21 = vld [vmem:[%s3339_s2 + $0x68] sm:$0xff]  ;;  %v305_v23 = vld [vmem:[%s3339_s2 + $0x70] sm:$0xff] }
  0x36   : > { %2391 = vmatprep.subr.bf16.mxu0 %v2809_v6  ;;  %2423 = vmatprep.subr.bf16.mxu1 %v2809_v6  ;;  %v2870_v22 = vpack.c.bf16 %v304_v21, %v303_v20  ;;  %v306_v24 = vld [vmem:[%s3339_s2 + $0x78] sm:$0xff]  ;;  %v1710_v33 = vld [vmem:[%s2783_s10 + $0x20] sm:$0xff] }
  0x37   : > { %v2882_v25 = vpack.c.bf16 %v306_v24, %v305_v23 }
  0x39   : > { %2393 = vmatpush3.bf16.msra.mxu0 %v2809_v6  ;;  %2425 = vmatpush3.bf16.msra.mxu1 %v2809_v6 }
  0x3a   : > { %2395 = vmatprep.subr.bf16.mxu0 %v2822_v9  ;;  %2427 = vmatprep.subr.bf16.mxu1 %v2822_v9 }
  0x3d   : > { %2397 = vmatpush3.bf16.msra.mxu0 %v2822_v9  ;;  %2429 = vmatpush3.bf16.msra.mxu1 %v2822_v9 }
  0x3e   : > { %2399 = vmatprep.subr.bf16.mxu0 %v2834_v13  ;;  %2431 = vmatprep.subr.bf16.mxu1 %v2834_v13 }
  0x41   : > { %2401 = vmatpush3.bf16.msra.mxu0 %v2834_v13  ;;  %2433 = vmatpush3.bf16.msra.mxu1 %v2834_v13 }
  0x42   : > { %2403 = vmatprep.subr.bf16.mxu0 %v2846_v16  ;;  %2435 = vmatprep.subr.bf16.mxu1 %v2846_v16 }
  0x45   : > { %2405 = vmatpush3.bf16.msra.mxu0 %v2846_v16  ;;  %2437 = vmatpush3.bf16.msra.mxu1 %v2846_v16 }
  0x46   : > { %2407 = vmatprep.subr.bf16.mxu0 %v2858_v19  ;;  %2439 = vmatprep.subr.bf16.mxu1 %v2858_v19 }
  0x49   : > { %2409 = vmatpush3.bf16.msra.mxu0 %v2858_v19  ;;  %2441 = vmatpush3.bf16.msra.mxu1 %v2858_v19 }
  0x4a   : > { %2411 = vmatprep.subr.bf16.mxu0 %v2870_v22  ;;  %2443 = vmatprep.subr.bf16.mxu1 %v2870_v22 }
  0x4d   : > { %2413 = vmatpush3.bf16.msra.mxu0 %v2870_v22  ;;  %2445 = vmatpush3.bf16.msra.mxu1 %v2870_v22 }
  0x4e   : > { %2415 = vmatprep.subr.bf16.mxu0 %v2882_v25  ;;  %2447 = vmatprep.subr.bf16.mxu1 %v2882_v25 }
  0x51   : > { %2417 = vmatpush3.bf16.msra.mxu0 %v2882_v25  ;;  %2449 = vmatpush3.bf16.msra.mxu1 %v2882_v25 }
  0x52   : > { %2451 = vmatprep.subr.bf16.mxu0 %v2804_v4  ;;  %2483 = vmatprep.subr.bf16.mxu1 %v2804_v4 }
  0x54   : > { %2115 = vmatmul.mubr.f32.vlgmr.msra.gmra.mrb[0].mxu0 %v326_v26 }
  0x55   : > { %2117 = vmatprep.mubr.f32.mxu0 %v327_v27  ;;  %2453 = vmatpush3.bf16.msra.mxu0 %v2804_v4 }
  0x56   : > { %2455 = vmatprep.subr.bf16.mxu0 %v2809_v6 }
  0x58   : > { %2118 = vmatmul.mubr.f32.gmra.mrb[2].mxu0 %v328_v28 }
  0x59   : > { %2457 = vmatpush3.bf16.msra.mxu0 %v2809_v6 }
  0x5a   : > { %2459 = vmatprep.subr.bf16.mxu0 %v2822_v9 }
  0x5d   : > { %2461 = vmatpush3.bf16.msra.mxu0 %v2822_v9 }
  0x5e   : > { %2463 = vmatprep.subr.bf16.mxu0 %v2834_v13 }
  0x61   : > { %2465 = vmatpush3.bf16.msra.mxu0 %v2834_v13 }
  0x62   : > { %2467 = vmatprep.subr.bf16.mxu0 %v2846_v16 }
  0x65   : > { %2469 = vmatpush3.bf16.msra.mxu0 %v2846_v16 }
  0x66   : > { %2471 = vmatprep.subr.bf16.mxu0 %v2858_v19 }
  0x69   : > { %2473 = vmatpush3.bf16.msra.mxu0 %v2858_v19 }
  0x6a   : > { %2475 = vmatprep.subr.bf16.mxu0 %v2870_v22 }
  0x6d   : > { %2477 = vmatpush3.bf16.msra.mxu0 %v2870_v22 }
  0x6e   : > { %2479 = vmatprep.subr.bf16.mxu0 %v2882_v25 }
  0x71   : > { %2481 = vmatpush3.bf16.msra.mxu0 %v2882_v25 }
  0x72   : > { %2515 = vmatprep.subr.bf16.mxu0 %v2804_v4 }
 0x127   : > { %v2116_v34 = vpop.f32.mrb[0].mxu0 }
 0x128   : > { %v421_v36 = vsub.f32 %v322_v29, %v2116_v34  ;;  %v401_v38 = vpop.f32.mrb[1].mxu0 }
 0x129   : > { %v420_v39 = vsub.f32 %v321_v32, %v401_v38  ;;  %v1711_v32 = vld [vmem:[%s2783_s10 + $0x28] sm:$0xff] }
 0x12a   : > { %v426_v43 = vmul.f32 %v2913_v35, %v421_v36 }
 0x12b   : > { %v425_v47 = vmul.f32 %v2913_v35, %v420_v39  ;;  %v2119_v48 = vpop.f32.mrb[2].mxu0 }
 0x12c   : > { %v2926_v49 = vadd.f32 %v431_v37, %v426_v43  ;;  %v423_v50 = vsub.f32 %v324_v41, %v2119_v48  ;;  %v411_v52 = vpop.f32.mrb[3].mxu0  ;;  %v587_v37 = vmul.f32 %v1711_v32, %v2910_v31  ;;  %v1713_v41 = vld [vmem:[%s2783_s10 + $0x38] sm:$0xff]  ;;  %v1712_v43 = vld [vmem:[%s2783_s10 + $0x30] sm:$0xff] }
 0x12d   : > { %v2929_v53 = vadd.f32 %v430_v40, %v425_v47  ;;  %v422_v54 = vsub.f32 %v323_v44, %v411_v52  ;;  %v586_v40 = vmul.f32 %v1710_v33, %v2910_v31 }
 0x12e   : > { %v439_v57 = vmul.f32 %v2923_v46, %v2926_v49  ;;  %v428_v58 = vmul.f32 %v2913_v35, %v423_v50 }
 0x12f   : > { %v427_v59 = vmul.f32 %v2913_v35, %v422_v54  ;;  %v438_v60 = vmul.f32 %v2923_v46, %v2929_v53 }
 0x130   : > { %v2943_v61 = vadd.f32 %v433_v51, %v428_v58  ;;  %v443_v62 = vsub.f32 %v439_v57, %v2935_v56 }
 0x131   : > { %v2946_v63 = vadd.f32 %v432_v55, %v427_v59  ;;  %v442_v0 = vsub.f32 %v438_v60, %v2935_v56 }
 0x132   : > { %vm447_vm0 = vcmp.gt.f32.partialorder %v443_v62, 0.0  ;;  %v441_v1 = vmul.f32 %v2923_v46, %v2943_v61 }
 0x133   : > { %vm446_vm1 = vcmp.gt.f32.partialorder %v442_v0, 0.0  ;;  %v451_v3 = vsel %vm447_vm0, 1.0, %v2713_v2  ;;  %v440_v5 = vmul.f32 %v2923_v46, %v2946_v63 }
 0x134   : > { %v450_v7 = vsel %vm446_vm1, 1.0, %v2713_v2  ;;  %2152 = vmatprep.mubr.msk.f32.mxu1 %vm446_vm1, %v2714_v8  ;;  %v445_v10 = vsub.f32 %v441_v1, %v2935_v56 }
 0x135   : > { %v1860_v11 = vpack.c.bf16 %v451_v3, %v450_v7  ;;  %2153 = vmatmul.mubr.msk.f32.vlgmr.msra.gmra.mrb[0].mxu1 %vm447_vm0, %v2714_v8  ;;  %v444_v12 = vsub.f32 %v440_v5, %v2935_v56  ;;  %v474_v14 = vadd.f32 %v451_v3, %v450_v7 }
 0x136   : > { %vm449_vm2 = vcmp.gt.f32.partialorder %v445_v10, 0.0  ;;  %2485 = vmatpush3.bf16.msra.mxu1 %v2804_v4 }
 0x137   : > { %1861 = vst [vmem:[%s2788_s13] sm:$0xff] %v1860_v11   ;;  %vm448_vm3 = vcmp.gt.f32.partialorder %v444_v12, 0.0  ;;  %v453_v15 = vsel %vm449_vm2, 1.0, %v2713_v2  ;;  %2487 = vmatprep.subr.bf16.mxu1 %v2809_v6 }
 0x138   : > { %2155 = vmatprep.mubr.msk.f32.mxu1 %vm448_vm3, %v2714_v8  ;;  %v452_v17 = vsel %vm448_vm3, 1.0, %v2713_v2 }
 0x139   : > { %2156 = vmatmul.mubr.msk.f32.gmra.mrb[2].mxu1 %vm449_vm2, %v2714_v8  ;;  %v1863_v18 = vpack.c.bf16 %v453_v15, %v452_v17  ;;  %v475_v20 = vadd.f32 %v474_v14, %v452_v17 }
 0x13a   : > { %2489 = vmatpush3.bf16.msra.mxu1 %v2809_v6 }
 0x13b   : > { %1907 = vst [vmem:[%s2788_s13 + $0x8] sm:$0xff] %v1863_v18   ;;  %v476_v21 = vadd.f32 %v475_v20, %v453_v15  ;;  %2491 = vmatprep.subr.bf16.mxu1 %v2822_v9 }
 0x13d   : > { %477 = vadd.xlane.f32.xlu0 %v476_v21 }
 0x13e   : > { %2493 = vmatpush3.bf16.msra.mxu1 %v2822_v9 }
 0x13f   : > { %2495 = vmatprep.subr.bf16.mxu1 %v2834_v13 }
 0x142   : > { %2497 = vmatpush3.bf16.msra.mxu1 %v2834_v13 }
 0x143   : > { %2499 = vmatprep.subr.bf16.mxu1 %v2846_v16 }
 0x146   : > { %2501 = vmatpush3.bf16.msra.mxu1 %v2846_v16 }
 0x147   : > { %2503 = vmatprep.subr.bf16.mxu1 %v2858_v19 }
 0x14a   : > { %2505 = vmatpush3.bf16.msra.mxu1 %v2858_v19 }
 0x14b   : > { %2507 = vmatprep.subr.bf16.mxu1 %v2870_v22 }
 0x14e   : > { %2509 = vmatpush3.bf16.msra.mxu1 %v2870_v22 }
 0x14f   : > { %2511 = vmatprep.subr.bf16.mxu1 %v2882_v25 }
 0x152   : > { %2513 = vmatpush3.bf16.msra.mxu1 %v2882_v25 }
 0x153   : > { %2547 = vmatprep.subr.bf16.mxu1 %v2804_v4 }
 0x1ca   : > { %v478_v23 = vpop.xlane.xlu0 %477 }
 0x1cb   : > { %v479_v24 = vrot.slane %v478_v23, 4 }
 0x1cd   : > { %v480_v26 = vadd.f32 %v479_v24, %v478_v23 }
 0x1cf   : > { %v481_v27 = vrot.slane %v480_v26, 2 }
 0x1d1   : > { %v482_v28 = vadd.f32 %v481_v27, %v480_v26 }
 0x1d3   : > { %v483_v29 = vrot.slane %v482_v28, 1 }
 0x1d5   : > { %v484_v30 = vadd.f32 %v483_v29, %v482_v28  ;;  %v1727_v29 = vld [vmem:[%s2783_s10 + $0x48] sm:$0xff] }
 0x1d7   : > { %2642 = vpush %v484_v30  ;;  %v1726_v30 = vld [vmem:[%s2783_s10 + $0x40] sm:$0xff] }
 0x208   : > { %v2154_v34 = vpop.f32.mrb[0].mxu1  ;;  %s2643_s19 = spop %2642 }
 0x209   : > { %v579_v36 = vsub.f32 %v2926_v49, %v2154_v34  ;;  %v559_v38 = vpop.f32.mrb[1].mxu1  ;;  %v589_v49 = vmul.f32 %v1713_v41, %v2910_v31  ;;  %v744_v34 = vmul.f32 %v1727_v29, %v2910_v31  ;;  %v1728_v41 = vld [vmem:[%s2783_s10 + $0x50] sm:$0xff]  ;;  %s486_s24 = sadd.f32 %s2643_s19, %s329_s18  ;;  %s487_s30 = smax.f32 %s2643_s19, %s1705_s20 }
 0x20a   : > { %v578_v39 = vsub.f32 %v2929_v53, %v559_v38  ;;  %v588_v53 = vmul.f32 %v1712_v43, %v2910_v31  ;;  %v743_v38 = vmul.f32 %v1726_v30, %v2910_v31 }
 0x20b   : > { %v583_v42 = vmul.f32 %v579_v36, %v2913_v35 }
 0x20c   : > { %v582_v44 = vmul.f32 %v578_v39, %v2913_v35  ;;  %v2157_v45 = vpop.f32.mrb[2].mxu1  ;;  %v1729_v39 = vld [vmem:[%s2783_s10 + $0x58] sm:$0xff] }
 0x20d   : > { %v2991_v47 = vadd.f32 %v587_v37, %v583_v42  ;;  %v581_v48 = vsub.f32 %v2943_v61, %v2157_v45  ;;  %v569_v50 = vpop.f32.mrb[3].mxu1 }
 0x20e   : > { %v2995_v51 = vadd.f32 %v586_v40, %v582_v44  ;;  %v580_v52 = vsub.f32 %v2946_v63, %v569_v50 }
 0x20f   : > { %v595_v54 = vmul.f32 %v2923_v46, %v2991_v47  ;;  %v585_v55 = vmul.f32 %v581_v48, %v2913_v35 }
 0x210   : > { %v584_v57 = vmul.f32 %v580_v52, %v2913_v35  ;;  %v594_v58 = vmul.f32 %v2923_v46, %v2995_v51 }
 0x211   : > { %v3005_v59 = vadd.f32 %v589_v49, %v585_v55  ;;  %v599_v60 = vsub.f32 %v595_v54, %v2935_v56 }
 0x212   : > { %v3008_v61 = vadd.f32 %v588_v53, %v584_v57  ;;  %v598_v62 = vsub.f32 %v594_v58, %v2935_v56 }
 0x213   : > { %vm603_vm4 = vcmp.gt.f32.partialorder %v599_v60, 0.0  ;;  %v597_v63 = vmul.f32 %v2923_v46, %v3005_v59 }
 0x214   : > { %vm602_vm5 = vcmp.gt.f32.partialorder %v598_v62, 0.0  ;;  %v607_v0 = vsel %vm603_vm4, 1.0, %v2713_v2  ;;  %v596_v1 = vmul.f32 %v2923_v46, %v3008_v61 }
 0x215   : > { %v606_v3 = vsel %vm602_vm5, 1.0, %v2713_v2  ;;  %2190 = vmatprep.mubr.msk.f32.mxu0 %vm602_vm5, %v2714_v8  ;;  %v601_v5 = vsub.f32 %v597_v63, %v2935_v56 }
 0x216   : > { %v1866_v7 = vpack.c.bf16 %v607_v0, %v606_v3  ;;  %2191 = vmatmul.mubr.msk.f32.vlgmr.msra.gmra.mrb[4].mxu0 %vm603_vm4, %v2714_v8  ;;  %v600_v10 = vsub.f32 %v596_v1, %v2935_v56  ;;  %v631_v12 = vadd.f32 %v607_v0, %v606_v3 }
 0x217   : > { %vm605_vm6 = vcmp.gt.f32.partialorder %v601_v5, 0.0  ;;  %2517 = vmatpush3.bf16.msra.mxu0 %v2804_v4 }
 0x218   : > { %1908 = vst [vmem:[%s2788_s13 + $0x10] sm:$0xff] %v1866_v7   ;;  %vm604_vm7 = vcmp.gt.f32.partialorder %v600_v10, 0.0  ;;  %v609_v11 = vsel %vm605_vm6, 1.0, %v2713_v2  ;;  %2519 = vmatprep.subr.bf16.mxu0 %v2809_v6 }
 0x219   : > { %2193 = vmatprep.mubr.msk.f32.mxu0 %vm604_vm7, %v2714_v8  ;;  %v608_v14 = vsel %vm604_vm7, 1.0, %v2713_v2 }
 0x21a   : > { %2194 = vmatmul.mubr.msk.f32.gmra.mrb[6].mxu0 %vm605_vm6, %v2714_v8  ;;  %v1869_v15 = vpack.c.bf16 %v609_v11, %v608_v14  ;;  %v632_v17 = vadd.f32 %v631_v12, %v608_v14 }
 0x21b   : > { %2521 = vmatpush3.bf16.msra.mxu0 %v2809_v6 }
 0x21c   : > { %1909 = vst [vmem:[%s2788_s13 + $0x18] sm:$0xff] %v1869_v15   ;;  %v633_v18 = vadd.f32 %v632_v17, %v609_v11  ;;  %2523 = vmatprep.subr.bf16.mxu0 %v2822_v9 }
 0x21e   : > { %634 = vadd.xlane.f32.xlu0 %v633_v18 }
 0x21f   : > { %2525 = vmatpush3.bf16.msra.mxu0 %v2822_v9 }
 0x220   : > { %2527 = vmatprep.subr.bf16.mxu0 %v2834_v13 }
 0x223   : > { %2529 = vmatpush3.bf16.msra.mxu0 %v2834_v13 }
 0x224   : > { %2531 = vmatprep.subr.bf16.mxu0 %v2846_v16 }
 0x227   : > { %2533 = vmatpush3.bf16.msra.mxu0 %v2846_v16 }
 0x228   : > { %2535 = vmatprep.subr.bf16.mxu0 %v2858_v19 }
 0x22b   : > { %2537 = vmatpush3.bf16.msra.mxu0 %v2858_v19 }
 0x22c   : > { %2539 = vmatprep.subr.bf16.mxu0 %v2870_v22 }
 0x22f   : > { %2541 = vmatpush3.bf16.msra.mxu0 %v2870_v22 }
 0x230   : > { %2543 = vmatprep.subr.bf16.mxu0 %v2882_v25 }
 0x233   : > { %2545 = vmatpush3.bf16.msra.mxu0 %v2882_v25 }
 0x234   : > { %2579 = vmatprep.subr.bf16.mxu0 %v2804_v4 }
 0x2ab   : > { %v635_v20 = vpop.xlane.xlu0 %634 }
 0x2ac   : > { %v636_v21 = vrot.slane %v635_v20, 4 }
 0x2ae   : > { %v637_v23 = vadd.f32 %v636_v21, %v635_v20 }
 0x2b0   : > { %v638_v24 = vrot.slane %v637_v23, 2 }
 0x2b2   : > { %v639_v26 = vadd.f32 %v638_v24, %v637_v23 }
 0x2b4   : > { %v640_v27 = vrot.slane %v639_v26, 1 }
 0x2b6   : > { %v641_v28 = vadd.f32 %v640_v27, %v639_v26  ;;  %v1743_v27 = vld [vmem:[%s2783_s10 + $0x68] sm:$0xff] }
 0x2b8   : > { %2644 = vpush %v641_v28  ;;  %v1742_v28 = vld [vmem:[%s2783_s10 + $0x60] sm:$0xff] }
 0x2e9   : > { %v2192_v32 = vpop.f32.mrb[4].mxu0  ;;  %s2645_s23 = spop %2644 }
 0x2ea   : > { %v736_v33 = vsub.f32 %v2991_v47, %v2192_v32  ;;  %v716_v36 = vpop.f32.mrb[5].mxu0  ;;  %v746_v47 = vmul.f32 %v1729_v39, %v2910_v31  ;;  %v901_v32 = vmul.f32 %v1743_v27, %v2910_v31  ;;  %v1744_v39 = vld [vmem:[%s2783_s10 + $0x70] sm:$0xff]  ;;  %s643_s26 = sadd.f32 %s2645_s23, %s486_s24  ;;  %s644_s8 = smax.f32 %s2645_s23, %s487_s30 }
 0x2eb   : > { %v735_v37 = vsub.f32 %v2995_v51, %v716_v36  ;;  %v745_v51 = vmul.f32 %v1728_v41, %v2910_v31  ;;  %v900_v36 = vmul.f32 %v1742_v28, %v2910_v31 }
 0x2ec   : > { %v740_v40 = vmul.f32 %v736_v33, %v2913_v35 }
 0x2ed   : > { %v739_v42 = vmul.f32 %v735_v37, %v2913_v35  ;;  %v2195_v43 = vpop.f32.mrb[6].mxu0  ;;  %v1745_v37 = vld [vmem:[%s2783_s10 + $0x78] sm:$0xff] }
 0x2ee   : > { %v3053_v44 = vadd.f32 %v744_v34, %v740_v40  ;;  %v738_v45 = vsub.f32 %v3005_v59, %v2195_v43  ;;  %v726_v48 = vpop.f32.mrb[7].mxu0 }
 0x2ef   : > { %v3057_v49 = vadd.f32 %v743_v38, %v739_v42  ;;  %v737_v50 = vsub.f32 %v3008_v61, %v726_v48 }
 0x2f0   : > { %v752_v52 = vmul.f32 %v2923_v46, %v3053_v44  ;;  %v742_v53 = vmul.f32 %v738_v45, %v2913_v35 }
 0x2f1   : > { %v741_v54 = vmul.f32 %v737_v50, %v2913_v35  ;;  %v751_v55 = vmul.f32 %v2923_v46, %v3057_v49 }
 0x2f2   : > { %v756_v57 = vsub.f32 %v752_v52, %v2935_v56  ;;  %v3068_v58 = vadd.f32 %v746_v47, %v742_v53 }
 0x2f3   : > { %v3070_v59 = vadd.f32 %v745_v51, %v741_v54  ;;  %v755_v60 = vsub.f32 %v751_v55, %v2935_v56 }
 0x2f4   : > { %vm760_vm8 = vcmp.gt.f32.partialorder %v756_v57, 0.0  ;;  %v754_v61 = vmul.f32 %v2923_v46, %v3068_v58 }
 0x2f5   : > { %vm759_vm9 = vcmp.gt.f32.partialorder %v755_v60, 0.0  ;;  %v753_v62 = vmul.f32 %v2923_v46, %v3070_v59  ;;  %v764_v63 = vsel %vm760_vm8, 1.0, %v2713_v2 }
 0x2f6   : > { %v763_v0 = vsel %vm759_vm9, 1.0, %v2713_v2  ;;  %2228 = vmatprep.mubr.msk.f32.mxu1 %vm759_vm9, %v2714_v8  ;;  %v758_v1 = vsub.f32 %v754_v61, %v2935_v56 }
 0x2f7   : > { %2229 = vmatmul.mubr.msk.f32.vlgmr.msra.gmra.mrb[4].mxu1 %vm760_vm8, %v2714_v8  ;;  %v757_v3 = vsub.f32 %v753_v62, %v2935_v56  ;;  %v1872_v5 = vpack.c.bf16 %v764_v63, %v763_v0  ;;  %v788_v10 = vadd.f32 %v764_v63, %v763_v0 }
 0x2f8   : > { %vm762_vm10 = vcmp.gt.f32.partialorder %v758_v1, 0.0  ;;  %2549 = vmatpush3.bf16.msra.mxu1 %v2804_v4 }
 0x2f9   : > { %vm761_vm11 = vcmp.gt.f32.partialorder %v757_v3, 0.0  ;;  %v766_v7 = vsel %vm762_vm10, 1.0, %v2713_v2  ;;  %1910 = vst [vmem:[%s2788_s13 + $0x20] sm:$0xff] %v1872_v5   ;;  %2551 = vmatprep.subr.bf16.mxu1 %v2809_v6 }
 0x2fa   : > { %2231 = vmatprep.mubr.msk.f32.mxu1 %vm761_vm11, %v2714_v8  ;;  %v765_v11 = vsel %vm761_vm11, 1.0, %v2713_v2 }
 0x2fb   : > { %2232 = vmatmul.mubr.msk.f32.gmra.mrb[6].mxu1 %vm762_vm10, %v2714_v8  ;;  %v789_v12 = vadd.f32 %v788_v10, %v765_v11  ;;  %v1875_v14 = vpack.c.bf16 %v766_v7, %v765_v11 }
 0x2fc   : > { %2553 = vmatpush3.bf16.msra.mxu1 %v2809_v6 }
 0x2fd   : > { %v790_v15 = vadd.f32 %v789_v12, %v766_v7  ;;  %1911 = vst [vmem:[%s2788_s13 + $0x28] sm:$0xff] %v1875_v14   ;;  %2555 = vmatprep.subr.bf16.mxu1 %v2822_v9 }
 0x2ff   : > { %791 = vadd.xlane.f32.xlu1 %v790_v15 }
 0x300   : > { %2557 = vmatpush3.bf16.msra.mxu1 %v2822_v9 }
 0x301   : > { %2559 = vmatprep.subr.bf16.mxu1 %v2834_v13 }
 0x304   : > { %2561 = vmatpush3.bf16.msra.mxu1 %v2834_v13 }
 0x305   : > { %2563 = vmatprep.subr.bf16.mxu1 %v2846_v16 }
 0x308   : > { %2565 = vmatpush3.bf16.msra.mxu1 %v2846_v16 }
 0x309   : > { %2567 = vmatprep.subr.bf16.mxu1 %v2858_v19 }
 0x30c   : > { %2569 = vmatpush3.bf16.msra.mxu1 %v2858_v19 }
 0x30d   : > { %2571 = vmatprep.subr.bf16.mxu1 %v2870_v22 }
 0x310   : > { %2573 = vmatpush3.bf16.msra.mxu1 %v2870_v22 }
 0x311   : > { %2575 = vmatprep.subr.bf16.mxu1 %v2882_v25 }
 0x314   : > { %2577 = vmatpush3.bf16.msra.mxu1 %v2882_v25 }
 0x315   : > { %2611 = vmatprep.subr.bf16.mxu1 %v2804_v4 }
 0x38c   : > { %v792_v17 = vpop.xlane.xlu1 %791 }
 0x38d   : > { %v793_v18 = vrot.slane %v792_v17, 4 }
 0x38f   : > { %v794_v20 = vadd.f32 %v793_v18, %v792_v17 }
 0x391   : > { %v795_v21 = vrot.slane %v794_v20, 2 }
 0x393   : > { %v796_v23 = vadd.f32 %v795_v21, %v794_v20 }
 0x395   : > { %v797_v24 = vrot.slane %v796_v23, 1 }
 0x397   : > { %v798_v26 = vadd.f32 %v797_v24, %v796_v23  ;;  %v1759_v24 = vld [vmem:[%s2783_s10 + $0x88] sm:$0xff] }
 0x399   : > { %2646 = vpush %v798_v26  ;;  %v1758_v26 = vld [vmem:[%s2783_s10 + $0x80] sm:$0xff] }
 0x3ca   : > { %v2230_v29 = vpop.f32.mrb[4].mxu1  ;;  %s2647_s25 = spop %2646 }
 0x3cb   : > { %v893_v30 = vsub.f32 %v3053_v44, %v2230_v29  ;;  %v873_v33 = vpop.f32.mrb[5].mxu1  ;;  %v903_v44 = vmul.f32 %v1745_v37, %v2910_v31  ;;  %v1058_v29 = vmul.f32 %v1759_v24, %v2910_v31  ;;  %v1760_v37 = vld [vmem:[%s2783_s10 + $0x90] sm:$0xff]  ;;  %s800_s28 = sadd.f32 %s2647_s25, %s643_s26  ;;  %s801_s11 = smax.f32 %s2647_s25, %s644_s8 }
 0x3cc   : > { %v892_v34 = vsub.f32 %v3057_v49, %v873_v33  ;;  %v902_v49 = vmul.f32 %v1744_v39, %v2910_v31  ;;  %v1057_v33 = vmul.f32 %v1758_v26, %v2910_v31  ;;  %v1776_v24 = vld [vmem:[%s2783_s10 + $0xb0] sm:$0xff] }
 0x3cd   : > { %v897_v38 = vmul.f32 %v893_v30, %v2913_v35 }
 0x3ce   : > { %v896_v40 = vmul.f32 %v892_v34, %v2913_v35  ;;  %v2233_v41 = vpop.f32.mrb[6].mxu1  ;;  %v1761_v34 = vld [vmem:[%s2783_s10 + $0x98] sm:$0xff] }
 0x3cf   : > { %v3115_v42 = vadd.f32 %v901_v32, %v897_v38  ;;  %v895_v43 = vsub.f32 %v3068_v58, %v2233_v41  ;;  %v883_v45 = vpop.f32.mrb[7].mxu1 }
 0x3d0   : > { %v3119_v47 = vadd.f32 %v900_v36, %v896_v40  ;;  %v894_v48 = vsub.f32 %v3070_v59, %v883_v45 }
 0x3d1   : > { %v909_v50 = vmul.f32 %v2923_v46, %v3115_v42  ;;  %v899_v51 = vmul.f32 %v895_v43, %v2913_v35 }
 0x3d2   : > { %v898_v52 = vmul.f32 %v894_v48, %v2913_v35  ;;  %v908_v53 = vmul.f32 %v2923_v46, %v3119_v47 }
 0x3d3   : > { %v3129_v54 = vadd.f32 %v903_v44, %v899_v51  ;;  %v913_v55 = vsub.f32 %v909_v50, %v2935_v56 }
 0x3d4   : > { %v3132_v57 = vadd.f32 %v902_v49, %v898_v52  ;;  %v912_v58 = vsub.f32 %v908_v53, %v2935_v56 }
 0x3d5   : > { %vm917_vm12 = vcmp.gt.f32.partialorder %v913_v55, 0.0  ;;  %v911_v59 = vmul.f32 %v2923_v46, %v3129_v54 }
 0x3d6   : > { %vm916_vm13 = vcmp.gt.f32.partialorder %v912_v58, 0.0  ;;  %v921_v60 = vsel %vm917_vm12, 1.0, %v2713_v2  ;;  %v910_v61 = vmul.f32 %v2923_v46, %v3132_v57 }
 0x3d7   : > { %v920_v62 = vsel %vm916_vm13, 1.0, %v2713_v2  ;;  %2266 = vmatprep.mubr.msk.f32.mxu0 %vm916_vm13, %v2714_v8  ;;  %v915_v63 = vsub.f32 %v911_v59, %v2935_v56 }
 0x3d8   : > { %v1878_v0 = vpack.c.bf16 %v921_v60, %v920_v62  ;;  %2267 = vmatmul.mubr.msk.f32.vlgmr.msra.gmra.mrb[8].mxu0 %vm917_vm12, %v2714_v8  ;;  %v914_v1 = vsub.f32 %v910_v61, %v2935_v56  ;;  %v945_v5 = vadd.f32 %v921_v60, %v920_v62 }
 0x3d9   : > { %vm919_vm14 = vcmp.gt.f32.partialorder %v915_v63, 0.0  ;;  %2581 = vmatpush3.bf16.msra.mxu0 %v2804_v4 }
 0x3da   : > { %1912 = vst [vmem:[%s2788_s13 + $0x30] sm:$0xff] %v1878_v0   ;;  %vm918_vm15 = vcmp.gt.f32.partialorder %v914_v1, 0.0  ;;  %v923_v3 = vsel %vm919_vm14, 1.0, %v2713_v2  ;;  %2583 = vmatprep.subr.bf16.mxu0 %v2809_v6 }
 0x3db   : > { %2269 = vmatprep.mubr.msk.f32.mxu0 %vm918_vm15, %v2714_v8  ;;  %v922_v7 = vsel %vm918_vm15, 1.0, %v2713_v2 }
 0x3dc   : > { %2270 = vmatmul.mubr.msk.f32.gmra.mrb[10].mxu0 %vm919_vm14, %v2714_v8  ;;  %v1881_v10 = vpack.c.bf16 %v923_v3, %v922_v7  ;;  %v946_v11 = vadd.f32 %v945_v5, %v922_v7 }
 0x3dd   : > { %2585 = vmatpush3.bf16.msra.mxu0 %v2809_v6 }
 0x3de   : > { %1913 = vst [vmem:[%s2788_s13 + $0x38] sm:$0xff] %v1881_v10   ;;  %v947_v12 = vadd.f32 %v946_v11, %v923_v3  ;;  %2587 = vmatprep.subr.bf16.mxu0 %v2822_v9 }
 0x3e0   : > { %948 = vadd.xlane.f32.xlu1 %v947_v12 }
 0x3e1   : > { %2589 = vmatpush3.bf16.msra.mxu0 %v2822_v9 }
 0x3e2   : > { %2591 = vmatprep.subr.bf16.mxu0 %v2834_v13 }
 0x3e5   : > { %2593 = vmatpush3.bf16.msra.mxu0 %v2834_v13 }
 0x3e6   : > { %2595 = vmatprep.subr.bf16.mxu0 %v2846_v16 }
 0x3e9   : > { %2597 = vmatpush3.bf16.msra.mxu0 %v2846_v16 }
 0x3ea   : > { %2599 = vmatprep.subr.bf16.mxu0 %v2858_v19 }
 0x3ed   : > { %2601 = vmatpush3.bf16.msra.mxu0 %v2858_v19 }
 0x3ee   : > { %2603 = vmatprep.subr.bf16.mxu0 %v2870_v22 }
 0x3f1   : > { %2605 = vmatpush3.bf16.msra.mxu0 %v2870_v22 }
 0x3f2   : > { %2607 = vmatprep.subr.bf16.mxu0 %v2882_v25 }
 0x3f5   : > { %2609 = vmatpush3.bf16.msra.mxu0 %v2882_v25 }
 0x46d   : > { %v949_v14 = vpop.xlane.xlu1 %948 }
 0x46e   : > { %v950_v15 = vrot.slane %v949_v14, 4 }
 0x470   : > { %v951_v17 = vadd.f32 %v950_v15, %v949_v14  ;;  %v1775_v14 = vld [vmem:[%s2783_s10 + $0xa8] sm:$0xff] }
 0x472   : > { %v952_v18 = vrot.slane %v951_v17, 2 }
 0x474   : > { %v953_v20 = vadd.f32 %v952_v18, %v951_v17 }
 0x476   : > { %v954_v21 = vrot.slane %v953_v20, 1 }
 0x478   : > { %v955_v23 = vadd.f32 %v954_v21, %v953_v20  ;;  %v1777_v21 = vld [vmem:[%s2783_s10 + $0xb8] sm:$0xff] }
 0x47a   : > { %2648 = vpush %v955_v23 }
 0x4ab   : > { %v2268_v27 = vpop.f32.mrb[8].mxu0  ;;  %s2649_s27 = spop %2648 }
 0x4ac   : > { %v1050_v28 = vsub.f32 %v3115_v42, %v2268_v27  ;;  %v1030_v30 = vpop.f32.mrb[9].mxu0  ;;  %v1060_v42 = vmul.f32 %v1761_v34, %v2910_v31  ;;  %s957_s29 = sadd.f32 %s2649_s27, %s800_s28  ;;  %s958_s14 = smax.f32 %s2649_s27, %s801_s11 }
 0x4ad   : > { %v1049_v32 = vsub.f32 %v3119_v47, %v1030_v30  ;;  %v1059_v47 = vmul.f32 %v1760_v37, %v2910_v31  ;;  %v1217_v30 = vmul.f32 %v1777_v21, %v2910_v31 }
 0x4ae   : > { %v1054_v36 = vmul.f32 %v1050_v28, %v2913_v35 }
 0x4af   : > { %v1053_v38 = vmul.f32 %v1049_v32, %v2913_v35  ;;  %v2271_v39 = vpop.f32.mrb[10].mxu0 }
 0x4b0   : > { %v3176_v40 = vadd.f32 %v1058_v29, %v1054_v36  ;;  %v1052_v41 = vsub.f32 %v3129_v54, %v2271_v39  ;;  %v1040_v43 = vpop.f32.mrb[11].mxu0  ;;  %v1216_v36 = vmul.f32 %v1776_v24, %v2910_v31 }
 0x4b1   : > { %v3180_v44 = vadd.f32 %v1057_v33, %v1053_v38  ;;  %v1051_v45 = vsub.f32 %v3132_v57, %v1040_v43 }
 0x4b2   : > { %v1066_v48 = vmul.f32 %v2923_v46, %v3176_v40  ;;  %v1056_v49 = vmul.f32 %v1052_v41, %v2913_v35 }
 0x4b3   : > { %v1055_v50 = vmul.f32 %v1051_v45, %v2913_v35  ;;  %v1065_v51 = vmul.f32 %v2923_v46, %v3180_v44 }
 0x4b4   : > { %v3190_v52 = vadd.f32 %v1060_v42, %v1056_v49  ;;  %v1070_v53 = vsub.f32 %v1066_v48, %v2935_v56 }
 0x4b5   : > { %v3193_v54 = vadd.f32 %v1059_v47, %v1055_v50  ;;  %v1069_v55 = vsub.f32 %v1065_v51, %v2935_v56 }
 0x4b6   : > { %vm1074_vm0 = vcmp.gt.f32.partialorder %v1070_v53, 0.0  ;;  %v1068_v57 = vmul.f32 %v2923_v46, %v3190_v52 }
 0x4b7   : > { %vm1073_vm1 = vcmp.gt.f32.partialorder %v1069_v55, 0.0  ;;  %v1078_v58 = vsel %vm1074_vm0, 1.0, %v2713_v2  ;;  %v1067_v59 = vmul.f32 %v2923_v46, %v3193_v54 }
 0x4b8   : > { %v1077_v60 = vsel %vm1073_vm1, 1.0, %v2713_v2  ;;  %2304 = vmatprep.mubr.msk.f32.mxu1 %vm1073_vm1, %v2714_v8  ;;  %v1072_v61 = vsub.f32 %v1068_v57, %v2935_v56 }
 0x4b9   : > { %v1884_v62 = vpack.c.bf16 %v1078_v58, %v1077_v60  ;;  %2305 = vmatmul.mubr.msk.f32.vlgmr.msra.gmra.mrb[8].mxu1 %vm1074_vm0, %v2714_v8  ;;  %v1071_v63 = vsub.f32 %v1067_v59, %v2935_v56  ;;  %v1102_v1 = vadd.f32 %v1078_v58, %v1077_v60 }
 0x4ba   : > { %vm1076_vm2 = vcmp.gt.f32.partialorder %v1072_v61, 0.0  ;;  %2613 = vmatpush3.bf16.msra.mxu1 %v2804_v4 }
 0x4bb   : > { %1914 = vst [vmem:[%s2788_s13 + $0x40] sm:$0xff] %v1884_v62   ;;  %vm1075_vm3 = vcmp.gt.f32.partialorder %v1071_v63, 0.0  ;;  %v1080_v0 = vsel %vm1076_vm2, 1.0, %v2713_v2  ;;  %2615 = vmatprep.subr.bf16.mxu1 %v2809_v6 }
 0x4bc   : > { %2307 = vmatprep.mubr.msk.f32.mxu1 %vm1075_vm3, %v2714_v8  ;;  %v1079_v3 = vsel %vm1075_vm3, 1.0, %v2713_v2 }
 0x4bd   : > { %2308 = vmatmul.mubr.msk.f32.gmra.mrb[10].mxu1 %vm1076_vm2, %v2714_v8  ;;  %v1887_v5 = vpack.c.bf16 %v1080_v0, %v1079_v3  ;;  %v1103_v7 = vadd.f32 %v1102_v1, %v1079_v3 }
 0x4be   : > { %2617 = vmatpush3.bf16.msra.mxu1 %v2809_v6 }
 0x4bf   : > { %1915 = vst [vmem:[%s2788_s13 + $0x48] sm:$0xff] %v1887_v5   ;;  %v1104_v10 = vadd.f32 %v1103_v7, %v1080_v0  ;;  %2619 = vmatprep.subr.bf16.mxu1 %v2822_v9  ;;  %v1791_v5 = vld [vmem:[%s2783_s10 + $0xc8] sm:$0xff]  ;;  %v1790_v7 = vld [vmem:[%s2783_s10 + $0xc0] sm:$0xff] }
 0x4c1   : > { %1105 = vadd.xlane.f32.xlu0 %v1104_v10 }
 0x4c2   : > { %2621 = vmatpush3.bf16.msra.mxu1 %v2822_v9 }
 0x4c3   : > { %2623 = vmatprep.subr.bf16.mxu1 %v2834_v13 }
 0x4c6   : > { %2625 = vmatpush3.bf16.msra.mxu1 %v2834_v13 }
 0x4c7   : > { %2627 = vmatprep.subr.bf16.mxu1 %v2846_v16 }
 0x4ca   : > { %2629 = vmatpush3.bf16.msra.mxu1 %v2846_v16 }
 0x4cb   : > { %2631 = vmatprep.subr.bf16.mxu1 %v2858_v19 }
 0x4ce   : > { %2633 = vmatpush3.bf16.msra.mxu1 %v2858_v19  ;;  %v1774_v19 = vld [vmem:[%s2783_s10 + $0xa0] sm:$0xff] }
 0x4cf   : > { %2635 = vmatprep.subr.bf16.mxu1 %v2870_v22  ;;  %v1214_v20 = vmul.f32 %v1774_v19, %v2910_v31 }
 0x4d2   : > { %2637 = vmatpush3.bf16.msra.mxu1 %v2870_v22  ;;  %v1215_v22 = vmul.f32 %v1775_v14, %v2910_v31  ;;  %v1792_v14 = vld [vmem:[%s2783_s10 + $0xd0] sm:$0xff] }
 0x4d3   : > { %2639 = vmatprep.subr.bf16.mxu1 %v2882_v25 }
 0x4d6   : > { %2641 = vmatpush3.bf16.msra.mxu1 %v2882_v25 }
 0x54e   : > { %v1106_v4 = vpop.xlane.xlu0 %1105 }
 0x54f   : > { %v1107_v6 = vrot.slane %v1106_v4, 4 }
 0x551   : > { %v1108_v9 = vadd.f32 %v1107_v6, %v1106_v4  ;;  %v1372_v6 = vmul.f32 %v1791_v5, %v2910_v31 }
 0x553   : > { %v1109_v13 = vrot.slane %v1108_v9, 2 }
 0x555   : > { %v1110_v16 = vadd.f32 %v1109_v13, %v1108_v9 }
 0x557   : > { %v1111_v11 = vrot.slane %v1110_v16, 1 }
 0x559   : > { %v1112_v12 = vadd.f32 %v1111_v11, %v1110_v16  ;;  %v1371_v16 = vmul.f32 %v1790_v7, %v2910_v31  ;;  %v1793_v11 = vld [vmem:[%s2783_s10 + $0xd8] sm:$0xff] }
 0x55b   : > { %2650 = vpush %v1112_v12 }
 0x58c   : > { %v2306_v15 = vpop.f32.mrb[8].mxu1 }
 0x58d   : > { %v1207_v17 = vsub.f32 %v3176_v40, %v2306_v15  ;;  %v1187_v18 = vpop.f32.mrb[9].mxu1 }
 0x58e   : > { %v1206_v25 = vsub.f32 %v3180_v44, %v1187_v18  ;;  %v1374_v18 = vmul.f32 %v1793_v11, %v2910_v31 }
 0x58f   : > { %v1211_v23 = vmul.f32 %v1207_v17, %v2913_v35 }
 0x590   : > { %v1210_v26 = vmul.f32 %v1206_v25, %v2913_v35  ;;  %v2309_v27 = vpop.f32.mrb[10].mxu1 }
 0x591   : > { %v1219_v28 = vadd.f32 %v1215_v22, %v1211_v23  ;;  %v1209_v29 = vsub.f32 %v3190_v52, %v2309_v27  ;;  %v1197_v32 = vpop.f32.mrb[11].mxu1  ;;  %v1373_v23 = vmul.f32 %v1792_v14, %v2910_v31 }
 0x592   : > { %v1218_v33 = vadd.f32 %v1214_v20, %v1210_v26  ;;  %v1208_v34 = vsub.f32 %v3193_v54, %v1197_v32 }
 0x593   : > { %v1223_v37 = vmul.f32 %v2923_v46, %v1219_v28  ;;  %v1213_v38 = vmul.f32 %v1209_v29, %v2913_v35 }
 0x594   : > { %v1212_v39 = vmul.f32 %v1208_v34, %v2913_v35  ;;  %v1222_v40 = vmul.f32 %v2923_v46, %v1218_v33 }
 0x595   : > { %v1221_v41 = vadd.f32 %v1217_v30, %v1213_v38  ;;  %v1227_v42 = vsub.f32 %v1223_v37, %v2935_v56 }
 0x596   : > { %v1220_v43 = vadd.f32 %v1216_v36, %v1212_v39  ;;  %v1226_v44 = vsub.f32 %v1222_v40, %v2935_v56 }
 0x597   : > { %vm1231_vm4 = vcmp.gt.f32.partialorder %v1227_v42, 0.0  ;;  %v1225_v45 = vmul.f32 %v2923_v46, %v1221_v41 }
 0x598   : > { %vm1230_vm5 = vcmp.gt.f32.partialorder %v1226_v44, 0.0  ;;  %v1235_v47 = vsel %vm1231_vm4, 1.0, %v2713_v2  ;;  %v1224_v48 = vmul.f32 %v2923_v46, %v1220_v43 }
 0x599   : > { %v1234_v49 = vsel %vm1230_vm5, 1.0, %v2713_v2  ;;  %2342 = vmatprep.mubr.msk.f32.mxu0 %vm1230_vm5, %v2714_v8  ;;  %v1229_v50 = vsub.f32 %v1225_v45, %v2935_v56 }
 0x59a   : > { %v1890_v51 = vpack.c.bf16 %v1235_v47, %v1234_v49  ;;  %2343 = vmatmul.mubr.msk.f32.vlgmr.msra.gmra.mrb[12].mxu0 %vm1231_vm4, %v2714_v8  ;;  %v1228_v52 = vsub.f32 %v1224_v48, %v2935_v56  ;;  %v1259_v54 = vadd.f32 %v1235_v47, %v1234_v49 }
 0x59b   : > { %vm1233_vm6 = vcmp.gt.f32.partialorder %v1229_v50, 0.0 }
 0x59c   : > { %1916 = vst [vmem:[%s2788_s13 + $0x50] sm:$0xff] %v1890_v51   ;;  %vm1232_vm7 = vcmp.gt.f32.partialorder %v1228_v52, 0.0  ;;  %v1237_v53 = vsel %vm1233_vm6, 1.0, %v2713_v2 }
 0x59d   : > { %2345 = vmatprep.mubr.msk.f32.mxu0 %vm1232_vm7, %v2714_v8  ;;  %v1236_v55 = vsel %vm1232_vm7, 1.0, %v2713_v2 }
 0x59e   : > { %2346 = vmatmul.mubr.msk.f32.gmra.mrb[14].mxu0 %vm1233_vm6, %v2714_v8  ;;  %v1893_v57 = vpack.c.bf16 %v1237_v53, %v1236_v55  ;;  %v1260_v58 = vadd.f32 %v1259_v54, %v1236_v55 }
 0x5a0   : > { %1917 = vst [vmem:[%s2788_s13 + $0x58] sm:$0xff] %v1893_v57   ;;  %v1261_v59 = vadd.f32 %v1260_v58, %v1237_v53  ;;  %v1807_v57 = vld [vmem:[%s2783_s10 + $0xe8] sm:$0xff]  ;;  %v1806_v58 = vld [vmem:[%s2783_s10 + $0xe0] sm:$0xff] }
 0x5a2   : > { %1262 = vadd.xlane.f32.xlu1 %v1261_v59 }
 0x62f   : > { %v1263_v60 = vpop.xlane.xlu1 %1262 }
 0x630   : > { %v1264_v61 = vrot.slane %v1263_v60, 4 }
 0x632   : > { %v1265_v62 = vadd.f32 %v1264_v61, %v1263_v60 }
 0x634   : > { %v1266_v63 = vrot.slane %v1265_v62, 2 }
 0x636   : > { %v1267_v0 = vadd.f32 %v1266_v63, %v1265_v62  ;;  %v1528_v63 = vmul.f32 %v1806_v58, %v2910_v31 }
 0x638   : > { %v1268_v1 = vrot.slane %v1267_v0, 1 }
 0x63a   : > { %v1269_v3 = vadd.f32 %v1268_v1, %v1267_v0  ;;  %v1809_v0 = vld [vmem:[%s2783_s10 + $0xf8] sm:$0xff] }
 0x63c   : > { %2652 = vpush %v1269_v3  ;;  %v1808_v3 = vld [vmem:[%s2783_s10 + $0xf0] sm:$0xff] }
 0x63d   : > { %v1530_v11 = vmul.f32 %v1808_v3, %v2910_v31 }
 0x66d   : > { %v2344_v10 = vpop.f32.mrb[12].mxu0 }
 0x66e   : > { %v1364_v4 = vsub.f32 %v1219_v28, %v2344_v10  ;;  %v1344_v9 = vpop.f32.mrb[13].mxu0 }
 0x66f   : > { %v1363_v13 = vsub.f32 %v1218_v33, %v1344_v9 }
 0x670   : > { %v1368_v12 = vmul.f32 %v1364_v4, %v2913_v35 }
 0x671   : > { %v1367_v19 = vmul.f32 %v1363_v13, %v2913_v35  ;;  %v2347_v15 = vpop.f32.mrb[14].mxu0 }
 0x672   : > { %v1376_v17 = vadd.f32 %v1372_v6, %v1368_v12  ;;  %v1366_v22 = vsub.f32 %v1221_v41, %v2347_v15  ;;  %v1354_v25 = vpop.f32.mrb[15].mxu0  ;;  %v1531_v6 = vmul.f32 %v1809_v0, %v2910_v31 }
 0x673   : > { %v1375_v20 = vadd.f32 %v1371_v16, %v1367_v19  ;;  %v1365_v21 = vsub.f32 %v1220_v43, %v1354_v25  ;;  %v2681_v19 = vld [vmem:[%s3328_s3] ss:$0 sm:$0xff] }
 0x674   : > { %v1380_v24 = vmul.f32 %v2923_v46, %v1376_v17  ;;  %v1370_v26 = vmul.f32 %v1366_v22, %v2913_v35 }
 0x675   : > { %v1369_v27 = vmul.f32 %v1365_v21, %v2913_v35  ;;  %v1379_v28 = vmul.f32 %v2923_v46, %v1375_v20 }
 0x676   : > { %v1378_v29 = vadd.f32 %v1374_v18, %v1370_v26  ;;  %v1384_v30 = vsub.f32 %v1380_v24, %v2935_v56 }
 0x677   : > { %v1377_v32 = vadd.f32 %v1373_v23, %v1369_v27  ;;  %v1383_v33 = vsub.f32 %v1379_v28, %v2935_v56  ;;  %v2682_v23 = vld [vmem:[%s3329_s4] ss:$0 sm:$0xff] }
 0x678   : > { %vm1388_vm8 = vcmp.gt.f32.partialorder %v1384_v30, 0.0  ;;  %v1382_v34 = vmul.f32 %v2923_v46, %v1378_v29 }
 0x679   : > { %vm1387_vm9 = vcmp.gt.f32.partialorder %v1383_v33, 0.0  ;;  %v1392_v36 = vsel %vm1388_vm8, 1.0, %v2713_v2  ;;  %v1381_v37 = vmul.f32 %v2923_v46, %v1377_v32 }
 0x67a   : > { %v1391_v38 = vsel %vm1387_vm9, 1.0, %v2713_v2  ;;  %2380 = vmatprep.mubr.msk.f32.mxu1 %vm1387_vm9, %v2714_v8  ;;  %v1386_v39 = vsub.f32 %v1382_v34, %v2935_v56 }
 0x67b   : > { %v1896_v40 = vpack.c.bf16 %v1392_v36, %v1391_v38  ;;  %2381 = vmatmul.mubr.msk.f32.vlgmr.msra.gmra.mrb[12].mxu1 %vm1388_vm8, %v2714_v8  ;;  %v1385_v41 = vsub.f32 %v1381_v37, %v2935_v56  ;;  %v1416_v43 = vadd.f32 %v1392_v36, %v1391_v38 }
 0x67c   : > { %vm1390_vm10 = vcmp.gt.f32.partialorder %v1386_v39, 0.0 }
 0x67d   : > { %1918 = vst [vmem:[%s2788_s13 + $0x60] sm:$0xff] %v1896_v40   ;;  %vm1389_vm11 = vcmp.gt.f32.partialorder %v1385_v41, 0.0  ;;  %v1394_v42 = vsel %vm1390_vm10, 1.0, %v2713_v2 }
 0x67e   : > { %2383 = vmatprep.mubr.msk.f32.mxu1 %vm1389_vm11, %v2714_v8  ;;  %v1393_v44 = vsel %vm1389_vm11, 1.0, %v2713_v2 }
 0x67f   : > { %2384 = vmatmul.mubr.msk.f32.gmra.mrb[14].mxu1 %vm1390_vm10, %v2714_v8  ;;  %v1899_v45 = vpack.c.bf16 %v1394_v42, %v1393_v44  ;;  %v1417_v47 = vadd.f32 %v1416_v43, %v1393_v44  ;;  %v1529_v8 = vmul.f32 %v1807_v57, %v2910_v31 }
 0x681   : > { %1919 = vst [vmem:[%s2788_s13 + $0x68] sm:$0xff] %v1899_v45   ;;  %v1418_v48 = vadd.f32 %v1417_v47, %v1394_v42 }
 0x683   : > { %1419 = vadd.xlane.f32.xlu0 %v1418_v48 }
 0x710   : > { %v1420_v49 = vpop.xlane.xlu0 %1419 }
 0x711   : > { %v1421_v50 = vrot.slane %v1420_v49, 4 }
 0x713   : > { %v1422_v51 = vadd.f32 %v1421_v50, %v1420_v49 }
 0x715   : > { %v1423_v52 = vrot.slane %v1422_v51, 2 }
 0x717   : > { %v1424_v53 = vadd.f32 %v1423_v52, %v1422_v51 }
 0x719   : > { %v1425_v54 = vrot.slane %v1424_v53, 1 }
 0x71b   : > { %v1426_v55 = vadd.f32 %v1425_v54, %v1424_v53 }
 0x71d   : > { %2654 = vpush %v1426_v55 }
 0x74e   : > { %v2382_v59 = vpop.f32.mrb[12].mxu1 }
 0x74f   : > { %v1521_v60 = vsub.f32 %v1376_v17, %v2382_v59  ;;  %v1501_v61 = vpop.f32.mrb[13].mxu1 }
 0x750   : > { %v1520_v62 = vsub.f32 %v1375_v20, %v1501_v61 }
 0x751   : > { %v1525_v1 = vmul.f32 %v1521_v60, %v2913_v35 }
 0x752   : > { %v1524_v5 = vmul.f32 %v1520_v62, %v2913_v35  ;;  %v2385_v7 = vpop.f32.mrb[14].mxu1 }
 0x753   : > { %v1533_v10 = vadd.f32 %v1529_v8, %v1525_v1  ;;  %v1523_v4 = vsub.f32 %v1378_v29, %v2385_v7  ;;  %v1511_v9 = vpop.f32.mrb[15].mxu1 }
 0x754   : > { %v1532_v13 = vadd.f32 %v1528_v63, %v1524_v5  ;;  %v1522_v16 = vsub.f32 %v1377_v32, %v1511_v9 }
 0x755   : > { %v1537_v12 = vmul.f32 %v2923_v46, %v1533_v10  ;;  %1588 = vst [vmem:[#allocation2 + $0x8] sm:$0xff] %v1533_v10  ;;  %v1527_v14 = vmul.f32 %v1523_v4, %v2913_v35 }
 0x756   : > { %v1536_v15 = vmul.f32 %v2681_v19, %v1532_v13  ;;  %1587 = vst [vmem:[#allocation2] sm:$0xff] %v1532_v13  ;;  %v1526_v17 = vmul.f32 %v1522_v16, %v2913_v35 }
 0x757   : > { %v1541_v22 = vsub.f32 %v1537_v12, %v2935_v56  ;;  %v1535_v18 = vadd.f32 %v1531_v6, %v1527_v14 }
 0x758   : > { %v1540_v25 = vsub.f32 %v1536_v15, %v2935_v56  ;;  %v1534_v20 = vadd.f32 %v1530_v11, %v1526_v17 }
 0x759   : > { %v1539_v31 = vmul.f32 %v2681_v19, %v1535_v18  ;;  %1590 = vst [vmem:[#allocation2 + $0x18] sm:$0xff] %v1535_v18  ;;  %vm1545_vm12 = vcmp.gt.f32.partialorder %v1541_v22, 0.0 }
 0x75a   : > { %v1538_v46 = vmul.f32 %v2681_v19, %v1534_v20  ;;  %1589 = vst [vmem:[#allocation2 + $0x10] sm:$0xff] %v1534_v20  ;;  %vm1544_vm13 = vcmp.gt.f32.partialorder %v1540_v25, 0.0  ;;  %v1549_v21 = vsel %vm1545_vm12, 1.0, %v2713_v2 }
 0x75b   : > { %v1543_v35 = vsub.f32 %v1539_v31, %v2682_v23  ;;  %v1548_v24 = vsel %vm1544_vm13, 1.0, %v2713_v2  ;;  %1592 = vst [vmem:[#allocation3 + $0x8] sm:$0xff] %v1549_v21 }
 0x75c   : > { %v1542_v56 = vsub.f32 %v1538_v46, %v2682_v23  ;;  %v1902_v26 = vpack.c.bf16 %v1549_v21, %v1548_v24  ;;  %v1573_v27 = vadd.f32 %v1549_v21, %v1548_v24  ;;  %1591 = vst [vmem:[#allocation3] sm:$0xff] %v1548_v24 }
 0x75d   : > { %vm1547_vm14 = vcmp.gt.f32.partialorder %v1543_v35, 0.0 }
 0x75e   : > { %vm1546_vm15 = vcmp.gt.f32.partialorder %v1542_v56, 0.0  ;;  %v1551_v28 = vsel %vm1547_vm14, 1.0, %v2713_v2  ;;  %1920 = vst [vmem:[%s2788_s13 + $0x70] sm:$0xff] %v1902_v26  }
 0x75f   : > { %v1550_v29 = vsel %vm1546_vm15, 1.0, %v2713_v2  ;;  %1594 = vst [vmem:[#allocation3 + $0x18] sm:$0xff] %v1551_v28  ;;  %v1603_v2 = vlaneseq (!%p1822_p2) }
 0x760   : > { %v1905_v30 = vpack.c.bf16 %v1551_v28, %v1550_v29  ;;  %v1574_v32 = vadd.f32 %v1573_v27, %v1550_v29  ;;  %1593 = vst [vmem:[#allocation3 + $0x10] sm:$0xff] %v1550_v29 }
 0x761   : > { %v1604_v42 = vand.u32 (!%p1822_p2), 127, %v1603_v2 }
 0x762   : > { %1921 = vst [vmem:[%s2788_s13 + $0x78] sm:$0xff] %v1905_v30   ;;  %v1575_v33 = vadd.f32 %v1574_v32, %v1551_v28  ;;  %s2651_s13 = spop %2650 }
 0x763   : > { %s2653_s7 = spop %2652  ;;  %s1114_s9 = sadd.f32 %s2651_s13, %s957_s29  ;;  %vm1605_vm0 = vcmp.eq.s32.totalorder (!%p1822_p2), %v1604_v42, 0  ;;  %vm1606_vm1 = vcmp.eq.s32.totalorder (!%p1822_p2), %v1604_v42, 1 }
 0x764   : > { %1576 = vadd.xlane.f32.xlu1 %v1575_v33  ;;  %s2655_s12 = spop %2654  ;;  %s1115_s16 = smax.f32 %s2651_s13, %s958_s14 }
 0x765   : > { %s1271_s15 = sadd.f32 %s2653_s7, %s1114_s9  ;;  %s1272_s10 = smax.f32 %s2653_s7, %s1115_s16 }
 0x766   : > { %s1429_s0 = smax.f32 %s2655_s12, %s1272_s10 }
 0x767   : > { %s1428_s17 = sadd.f32 %s2655_s12, %s1271_s15 }
 0x7f1   : > { %v1577_v34 = vpop.xlane.xlu1 %1576 }
 0x7f2   : > { %v1578_v36 = vrot.slane %v1577_v34, 4 }
 0x7f4   : > { %v1579_v37 = vadd.f32 %v1578_v36, %v1577_v34 }
 0x7f6   : > { %v1580_v38 = vrot.slane %v1579_v37, 2 }
 0x7f8   : > { %v1581_v39 = vadd.f32 %v1580_v38, %v1579_v37 }
 0x7fa   : > { %v1582_v40 = vrot.slane %v1581_v39, 1 }
 0x7fc   : > { %v1583_v41 = vadd.f32 %v1582_v40, %v1581_v39 }
 0x7fe   : > { %2656 = vpush %v1583_v41 }
 0x82c   : > { %1602 = sbr.rel (%p1822_p2) target bundleno = 2101 (0x835), region = 52 }
 0x82f   : > { %s2657_s1 = spop %2656 }
 0x830   : > { %s1585_s18 = sadd.f32 %s2657_s1, %s1428_s17  ;;  %s1586_s2 = smax.f32 %s2657_s1, %s1429_s0 }
 0x831   : > { %1598 = sst [smem:[#allocation4 + $0x1]] %s1586_s2  ;;  %v1607_v43 = vstv (!%p1822_p2), %s1586_s2 }
 0x832   : > { %1596 = sst [smem:[#allocation4]] %s1585_s18  ;;  %v1609_v44 = vstv (!%p1822_p2), %s1585_s18  ;;  %v1608_v45 = vsel (!%p1822_p2), %vm1606_vm1, %v1607_v43, 0.0 }
 0x833   : > { %v1610_v47 = vsel %vm1605_vm0, %v1609_v44, %v1608_v45 }
 0x834   : > { %1611 = vst [vmem:[%s3331_s6] sm:$0x1] %v1610_v47 }
 0x835 PF: > { %s18_s21 = sadd.s32 1, %s2708_s21  }
 0x836   : > { %p15_p3 = scmp.ge.s32.totalorder %s18_s21, 4  }
 0x838   :  { %17 = sbr.rel (!%p15_p3) target bundleno = 5 (0x5), region = 109 }
 0x83f   :  { %1642 = vsyncpa [#allocation6], 1 }
 0x840   :  { %1644 = vsyncpa [#allocation6 + $0x1], 1 }

</bundles_post_ra>
